<compile_context>
chip_gen: v5e
topology: v5e:2x2
jax: 0.10.0
libtpu: 0.0.40
codegen_flags: <defaults>
</compile_context>

<pallas_src>
import functools

import jax
import jax.numpy as jnp
from jax.experimental import pallas as pl
from jax.experimental.pallas import tpu as pltpu
import numpy as np


def _cross_attn_kernel(
    x_rgb_ref, x_ind_ref,
    w_rgb_ref, b_rgb_ref, w_ind_ref, b_ind_ref,
    f_final_ref, attn_w_ref,
    kvq_rgb_scr, kvq_ind_scr,
    *, tq, channels, c_pad):
  """Grid = (B, N // tq).

  x refs: (1, C, N) f32. Packed weights: (3*Cp, C) bf16, bias (3*Cp, 1) f32
  (Q rows pre-scaled by 1/sqrt(C)). Outputs: (1, C, tq) and (1, 2, C, tq) f32.
  Scratch: one (3*Cp, N) bf16 [K;V;Q] buffer per stream, cached per batch elem.
  """
  qi = pl.program_id(1)

  # ---- Per-batch-element projections, cached in VMEM scratch ---------------
  @pl.when(qi == 0)
  def _project():
    def project(x_ref, w_ref, b_ref, scr):
      x_bf = x_ref[0].astype(jnp.bfloat16)                       # (C, N)
      kvq = jnp.dot(w_ref[...], x_bf,
                    preferred_element_type=jnp.float32)          # (3*Cp, N)
      kvq = kvq + b_ref[...]                                     # (3*Cp,1) bcast
      scr[...] = kvq.astype(jnp.bfloat16)

    project(x_rgb_ref, w_rgb_ref, b_rgb_ref, kvq_rgb_scr)
    project(x_ind_ref, w_ind_ref, b_ind_ref, kvq_ind_scr)

  # ---- Attention for this query-column tile ---------------------------------
  q_start = pl.multiple_of(qi * tq, tq)

  def attend(q_scr, kv_scr):
    # Q is already scaled by 1/sqrt(C) (folded into the packed weights).
    q = q_scr[2 * c_pad:2 * c_pad + channels, pl.ds(q_start, tq)]  # (C, tq) bf16
    k = kv_scr[0:channels, :]                                      # (C, N)  bf16
    v = kv_scr[c_pad:c_pad + channels, :]                          # (C, N)  bf16
    # s[j, i] = sum_c K[c, j] * Q[c, i]  -> (N, tq); softmax over j (sublanes).
    s = jax.lax.dot_general(k, q, (((0,), (0,)), ((), ())),
                            preferred_element_type=jnp.float32)    # (N, tq)
    m = jnp.max(s, axis=0, keepdims=True)                          # (1, tq)
    p = jnp.exp(s - m)                                             # (N, tq) f32
    l = jnp.sum(p, axis=0, keepdims=True)                          # (1, tq)
    # out[c, i] = sum_j V[c, j] * p[j, i]  -> (C, tq)
    out = jnp.dot(v, p.astype(jnp.bfloat16),
                  preferred_element_type=jnp.float32)
    # Deferred softmax normalization: O(C*tq) instead of O(tq*N); exact recip.
    return out * (1.0 / l)

  out_rgb = attend(kvq_rgb_scr, kvq_ind_scr)   # Q from rgb,     K/V from indices
  out_ind = attend(kvq_ind_scr, kvq_rgb_scr)   # Q from indices, K/V from rgb

  attn_w_ref[0, 0] = out_rgb.astype(attn_w_ref.dtype)
  attn_w_ref[0, 1] = out_ind.astype(attn_w_ref.dtype)
  f_final_ref[0] = (out_rgb + out_ind).astype(f_final_ref.dtype)


def init_params(key, channels):
  """Deterministic parameter init matching nn.Conv2d(C, C, 1) shapes."""
  names = ["query_rgb", "key_rgb", "value_rgb",
           "query_indices", "key_indices", "value_indices"]
  params = {}
  bound = 1.0 / np.sqrt(channels)  # PyTorch conv default init range
  for name in names:
    key, kw, kb = jax.random.split(key, 3)
    w = jax.random.uniform(kw, (channels, channels), jnp.float32, -bound, bound)
    b = jax.random.uniform(kb, (channels,), jnp.float32, -bound, bound)
    params[name] = (w, b)
  return params


def _vmem_cap_bytes():
  """Physical VMEM per TensorCore; conservative 64 MiB (v7x) fallback."""
  try:
    return int(pltpu.get_tpu_info().vmem_capacity_bytes)
  except Exception:
    return 64 * 2**20


@functools.partial(jax.jit, static_argnames=("max_q_tile",))
def cross_attention_forward(f_rgb, f_ind, params, *, max_q_tile=256):
  """Mirrors CrossAttentionModule.forward([F_rgb, F_indices])."""
  B, C, H, W = f_rgb.shape
  N = H * W

  # Free reshapes: NCHW -> (B, C, N). No wrapper-side transposes.
  x_rgb = f_rgb.reshape(B, C, N)
  x_ind = f_ind.reshape(B, C, N)

  # Query tile: largest multiple of 128 dividing N and <= max_q_tile
  # (default capped at 256 for v7x's 64 MiB VMEM); fall back to full N.
  cands = [c for c in range(128, min(max_q_tile, N) + 1, 128) if N % c == 0]
  tq = max(cands) if cands else N
  nq = N // tq

  # bf16 sublane tile is 16 rows: pad each K/V/Q row-block so slicing the
  # packed projection scratch never needs a relayout copy.
  c_pad = -(-C // 16) * 16
  scale = float(C) ** -0.5

  # ---- Pack weights: [K; V; Q/sqrt(C)] per stream (tiny, one-time) ---------
  def pack(stream):
    wq, bq = params["query_" + stream]
    wk, bk = params["key_" + stream]
    wv, bv = params["value_" + stream]

    def pad_rows(a):
      return jnp.pad(a, ((0, c_pad - C),) + ((0, 0),) * (a.ndim - 1))

    w = jnp.concatenate(
        [pad_rows(wk), pad_rows(wv), pad_rows(wq * scale)], axis=0)      # (3Cp, C)
    b = jnp.concatenate(
        [pad_rows(bk), pad_rows(bv), pad_rows(bq * scale)], axis=0)      # (3Cp,)
    return w.astype(jnp.bfloat16), b.reshape(3 * c_pad, 1).astype(jnp.float32)

  w_rgb, b_rgb = pack("rgb")
  w_ind, b_ind = pack("indices")

  spec_x = pl.BlockSpec((1, C, N), lambda b, q: (b, 0, 0))
  spec_w = pl.BlockSpec((3 * c_pad, C), lambda b, q: (0, 0))
  spec_b = pl.BlockSpec((3 * c_pad, 1), lambda b, q: (0, 0))

  out_shape = (
      jax.ShapeDtypeStruct((B, C, N), jnp.float32),      # F_final
      jax.ShapeDtypeStruct((B, 2, C, N), jnp.float32),   # stacked attended
  )
  out_specs = [
      pl.BlockSpec((1, C, tq), lambda b, q: (b, 0, q)),
      pl.BlockSpec((1, 2, C, tq), lambda b, q: (b, 0, 0, q)),
  ]

  scratch_shapes = [
      pltpu.VMEM((3 * c_pad, N), jnp.bfloat16),   # [K; V; Q] rgb
      pltpu.VMEM((3 * c_pad, N), jnp.bfloat16),   # [K; V; Q] indices
  ]

  # Scoped-VMEM budget, capped by the actual chip generation's capacity.
  vmem_need = (
      2 * 2 * (C * N * 4)                     # double-buffered f32 x blocks, 2 streams
      + 2 * (3 * C * tq * 4)                  # double-buffered output blocks
      + 2 * (3 * c_pad * N * 2)               # bf16 [K;V;Q] scratch, 2 streams
      + 3 * (tq * N * 4)                      # score / prob f32 intermediates
      + 2 * 2 * (3 * c_pad * (C * 2 + 4))     # packed weights + biases
  )
  cap = _vmem_cap_bytes()
  vmem_limit = int(min(max(int(1.25 * vmem_need), 32 * 2**20), cap - 8 * 2**20))

  cost = pl.CostEstimate(
      flops=int(B * (12 * C * C * N + 8 * C * N * N)),
      transcendentals=int(B * 2 * N * N),
      bytes_accessed=int(5 * B * C * N * 4 + 2 * 3 * c_pad * (C * 2 + 4)),
  )

  kernel = functools.partial(_cross_attn_kernel, tq=tq, channels=C, c_pad=c_pad)

  f_final, attn_w = pl.pallas_call(
      kernel,
      out_shape=out_shape,
      grid_spec=pltpu.PrefetchScalarGridSpec(
          num_scalar_prefetch=0,
          grid=(B, nq),
          in_specs=[spec_x, spec_x, spec_w, spec_b, spec_w, spec_b],
          out_specs=out_specs,
          scratch_shapes=scratch_shapes),
      compiler_params=pltpu.CompilerParams(
          dimension_semantics=("parallel", "arbitrary"),
          vmem_limit_bytes=vmem_limit),
      cost_estimate=cost,
  )(x_rgb, x_ind, w_rgb, b_rgb, w_ind, b_ind)

  # Free reshapes back to NCHW-style outputs.
  F_final = f_final.reshape(B, C, H, W)
  attention_weights = attn_w.reshape(B, 2, C, H, W)
  pre_attention_outputs = [f_rgb, f_ind]
  return F_final, pre_attention_outputs, attention_weights


def _reference_forward(f_rgb, f_ind, params):
  """Pure-JAX f32 reference mirroring the PyTorch math (NCHW)."""
  B, C, H, W = f_rgb.shape

  def conv1x1(x, name):
    w, b = params[name]
    return jnp.einsum("oc,bchw->bohw", w, x) + b[None, :, None, None]

  def attention(Q, K, V):
    Qf = Q.reshape(B, C, H * W)
    Kf = K.reshape(B, C, H * W)
    Vf = V.reshape(B, C, H * W)
    attn = jnp.einsum("bci,bcj->bij", Qf, Kf) / jnp.sqrt(jnp.float32(C))
    attn = jax.nn.softmax(attn, axis=-1)
    out = jnp.einsum("bcj,bij->bci", Vf, attn)
    return out.reshape(B, C, H, W)

  F_rgb_att = attention(conv1x1(f_rgb, "query_rgb"),
                        conv1x1(f_ind, "key_indices"),
                        conv1x1(f_ind, "value_indices"))
  F_ind_att = attention(conv1x1(f_ind, "query_indices"),
                        conv1x1(f_rgb, "key_rgb"),
                        conv1x1(f_rgb, "value_rgb"))
  F_final = F_rgb_att + F_ind_att
  attention_weights = jnp.stack([F_rgb_att, F_ind_att], axis=1)
  return F_final, [f_rgb, f_ind], attention_weights


if __name__ == "__main__":
  # Small shapes consistent with (B, in_channels, H, W); N = 256 is lane-dense.
  B, C, H, W = 2, 32, 16, 16

  key = jax.random.PRNGKey(0)
  key, k1, k2, kp = jax.random.split(key, 4)
  f_rgb = jax.random.normal(k1, (B, C, H, W), jnp.float32)
  f_ind = jax.random.normal(k2, (B, C, H, W), jnp.float32)
  params = init_params(kp, C)

  # max_q_tile=128 -> two query tiles per batch element, exercising the
  # per-batch-element K/V/Q scratch caching path.
  F_final, pre_outs, attn_w = cross_attention_forward(
      f_rgb, f_ind, params, max_q_tile=128)
  jax.block_until_ready((F_final, attn_w))

  # Correctness vs. a pure-f32 JAX reference of the PyTorch math.
  # Tolerance loosened vs f32-only because MXU operands are bf16.
  F_final_ref, _, attn_w_ref = _reference_forward(f_rgb, f_ind, params)
  np.testing.assert_allclose(np.asarray(F_final), np.asarray(F_final_ref),
                             rtol=2e-2, atol=2e-2)
  np.testing.assert_allclose(np.asarray(attn_w), np.asarray(attn_w_ref),
                             rtol=2e-2, atol=2e-2)
  assert F_final.shape == (B, C, H, W)
  assert attn_w.shape == (B, 2, C, H, W)
  assert len(pre_outs) == 2

  print("KERNEL_OK")
</pallas_src>

<mosaic_0001>
module attributes {stable_mosaic.version = 11 : i64} {
  func.func @_cross_attn_kernel(%arg0: i32, %arg1: i32, %arg2: memref<1x32x256xf32, #tpu.memory_space<vmem>>, %arg3: memref<1x32x256xf32, #tpu.memory_space<vmem>>, %arg4: memref<96x32xbf16, #tpu.memory_space<vmem>>, %arg5: memref<96x1xf32, #tpu.memory_space<vmem>>, %arg6: memref<96x32xbf16, #tpu.memory_space<vmem>>, %arg7: memref<96x1xf32, #tpu.memory_space<vmem>>, %arg8: memref<1x32x128xf32, #tpu.memory_space<vmem>>, %arg9: memref<1x2x32x128xf32, #tpu.memory_space<vmem>>, %arg10: memref<96x256xbf16, #tpu.memory_space<vmem>>, %arg11: memref<96x256xbf16, #tpu.memory_space<vmem>>) attributes {dimension_semantics = [#tpu.dimension_semantics<parallel>, #tpu.dimension_semantics<arbitrary>], iteration_bounds = array<i64: 2, 2>, scalar_prefetch = 0 : i64, scratch_operands = 2 : i64, tpu.core_type = #tpu.core_type<tc>, window_params = [{transform_indices = @transform_0, window_bounds = array<i64: 1, 32, 256>}, {transform_indices = @transform_1, window_bounds = array<i64: 1, 32, 256>}, {pipeline_mode = #tpu.pipeline_mode<synchronous>, transform_indices = @transform_2, window_bounds = array<i64: 96, 32>}, {pipeline_mode = #tpu.pipeline_mode<synchronous>, transform_indices = @transform_3, window_bounds = array<i64: 96, 1>}, {pipeline_mode = #tpu.pipeline_mode<synchronous>, transform_indices = @transform_4, window_bounds = array<i64: 96, 32>}, {pipeline_mode = #tpu.pipeline_mode<synchronous>, transform_indices = @transform_5, window_bounds = array<i64: 96, 1>}, {transform_indices = @transform_6, window_bounds = array<i64: 1, 32, 128>}, {transform_indices = @transform_7, window_bounds = array<i64: 1, 2, 32, 128>}]} {
    %c0_i32 = arith.constant 0 : i32
    %0 = arith.cmpi eq, %arg1, %c0_i32 : i32
    %1 = arith.extui %0 : i1 to i32
    %c0_i32_0 = arith.constant 0 : i32
    %2 = arith.cmpi ne, %1, %c0_i32_0 : i32
    scf.if %2 {
      %c0_27 = arith.constant 0 : index
      %c0_28 = arith.constant 0 : index
      %c0_29 = arith.constant 0 : index
      %51 = vector.load %arg2[%c0_27, %c0_28, %c0_29] : memref<1x32x256xf32, #tpu.memory_space<vmem>>, vector<1x32x256xf32>
      %52 = vector.shape_cast %51 : vector<1x32x256xf32> to vector<32x256xf32>
      %53 = arith.truncf %52 : vector<32x256xf32> to vector<32x256xbf16>
      %c0_30 = arith.constant 0 : index
      %c0_31 = arith.constant 0 : index
      %54 = vector.load %arg4[%c0_30, %c0_31] : memref<96x32xbf16, #tpu.memory_space<vmem>>, vector<96x32xbf16>
      %cst_32 = arith.constant dense<0.000000e+00> : vector<96x256xf32>
      %55 = tpu.matmul %54, %53, %cst_32 {dimension_numbers = #tpu.dot_dimension_numbers<[1], [0], [0], [1], [0, 0, 1, 1], [], []>} : vector<96x32xbf16>, vector<32x256xbf16>, vector<96x256xf32> -> vector<96x256xf32>
      %c0_33 = arith.constant 0 : index
      %c0_34 = arith.constant 0 : index
      %56 = vector.load %arg5[%c0_33, %c0_34] : memref<96x1xf32, #tpu.memory_space<vmem>>, vector<96x1xf32>
      %57 = vector.broadcast %56 : vector<96x1xf32> to vector<96x256xf32>
      %58 = arith.addf %55, %57 : vector<96x256xf32>
      %59 = arith.truncf %58 : vector<96x256xf32> to vector<96x256xbf16>
      %c0_35 = arith.constant 0 : index
      %c0_36 = arith.constant 0 : index
      %60 = vector.load %arg10[%c0_35, %c0_36] : memref<96x256xbf16, #tpu.memory_space<vmem>>, vector<96x256xbf16>
      tpu.vector_store %arg10[%c0_35, %c0_36], %59 {strides = array<i32>} : memref<96x256xbf16, #tpu.memory_space<vmem>>, vector<96x256xbf16>,
      %c0_37 = arith.constant 0 : index
      %c0_38 = arith.constant 0 : index
      %c0_39 = arith.constant 0 : index
      %61 = vector.load %arg3[%c0_37, %c0_38, %c0_39] : memref<1x32x256xf32, #tpu.memory_space<vmem>>, vector<1x32x256xf32>
      %62 = vector.shape_cast %61 : vector<1x32x256xf32> to vector<32x256xf32>
      %63 = arith.truncf %62 : vector<32x256xf32> to vector<32x256xbf16>
      %c0_40 = arith.constant 0 : index
      %c0_41 = arith.constant 0 : index
      %64 = vector.load %arg6[%c0_40, %c0_41] : memref<96x32xbf16, #tpu.memory_space<vmem>>, vector<96x32xbf16>
      %cst_42 = arith.constant dense<0.000000e+00> : vector<96x256xf32>
      %65 = tpu.matmul %64, %63, %cst_42 {dimension_numbers = #tpu.dot_dimension_numbers<[1], [0], [0], [1], [0, 0, 1, 1], [], []>} : vector<96x32xbf16>, vector<32x256xbf16>, vector<96x256xf32> -> vector<96x256xf32>
      %c0_43 = arith.constant 0 : index
      %c0_44 = arith.constant 0 : index
      %66 = vector.load %arg7[%c0_43, %c0_44] : memref<96x1xf32, #tpu.memory_space<vmem>>, vector<96x1xf32>
      %67 = vector.broadcast %66 : vector<96x1xf32> to vector<96x256xf32>
      %68 = arith.addf %65, %67 : vector<96x256xf32>
      %69 = arith.truncf %68 : vector<96x256xf32> to vector<96x256xbf16>
      %c0_45 = arith.constant 0 : index
      %c0_46 = arith.constant 0 : index
      %70 = vector.load %arg11[%c0_45, %c0_46] : memref<96x256xbf16, #tpu.memory_space<vmem>>, vector<96x256xbf16>
      tpu.vector_store %arg11[%c0_45, %c0_46], %69 {strides = array<i32>} : memref<96x256xbf16, #tpu.memory_space<vmem>>, vector<96x256xbf16>,
    } else {
    }
    %c128_i32 = arith.constant 128 : i32
    %3 = arith.muli %arg1, %c128_i32 : i32
    %4 = tpu.assume_multiple %3, 128 : i32
    %c64 = arith.constant 64 : index
    %5 = arith.index_cast %4 : i32 to index
    %6 = vector.load %arg10[%c64, %5] : memref<96x256xbf16, #tpu.memory_space<vmem>>, vector<32x128xbf16>
    %c0 = arith.constant 0 : index
    %c0_1 = arith.constant 0 : index
    %7 = vector.load %arg11[%c0, %c0_1] : memref<96x256xbf16, #tpu.memory_space<vmem>>, vector<32x256xbf16>
    %c32 = arith.constant 32 : index
    %c0_2 = arith.constant 0 : index
    %8 = vector.load %arg11[%c32, %c0_2] : memref<96x256xbf16, #tpu.memory_space<vmem>>, vector<32x256xbf16>
    %cst = arith.constant dense<0.000000e+00> : vector<256x128xf32>
    %9 = tpu.matmul %7, %6, %cst {dimension_numbers = #tpu.dot_dimension_numbers<[0], [0], [1], [1], [0, 1, 1, 1], [], []>} : vector<32x256xbf16>, vector<32x128xbf16>, vector<256x128xf32> -> vector<256x128xf32>
    %cst_3 = arith.constant dense<0xFF800000> : vector<128xf32>
    %10 = vector.multi_reduction <maximumf>, %9, %cst_3 [0] : vector<256x128xf32> to vector<128xf32>
    %11 = vector.shape_cast %10 : vector<128xf32> to vector<1x128xf32>
    %12 = vector.broadcast %11 : vector<1x128xf32> to vector<256x128xf32>
    %13 = arith.subf %9, %12 : vector<256x128xf32>
    %14 = math.exp %13 : vector<256x128xf32>
    %cst_4 = arith.constant dense<0.000000e+00> : vector<128xf32>
    %15 = vector.multi_reduction <add>, %14, %cst_4 [0] : vector<256x128xf32> to vector<128xf32>
    %16 = vector.shape_cast %15 : vector<128xf32> to vector<1x128xf32>
    %17 = arith.truncf %14 : vector<256x128xf32> to vector<256x128xbf16>
    %cst_5 = arith.constant dense<0.000000e+00> : vector<32x128xf32>
    %18 = tpu.matmul %8, %17, %cst_5 {dimension_numbers = #tpu.dot_dimension_numbers<[1], [0], [0], [1], [0, 0, 1, 1], [], []>} : vector<32x256xbf16>, vector<256x128xbf16>, vector<32x128xf32> -> vector<32x128xf32>
    %cst_6 = arith.constant 1.000000e+00 : f32
    %19 = vector.broadcast %cst_6 : f32 to vector<1x128xf32>
    %20 = arith.divf %19, %16 : vector<1x128xf32>
    %21 = vector.broadcast %20 : vector<1x128xf32> to vector<32x128xf32>
    %22 = arith.mulf %18, %21 : vector<32x128xf32>
    %c64_7 = arith.constant 64 : index
    %23 = arith.index_cast %4 : i32 to index
    %24 = vector.load %arg11[%c64_7, %23] : memref<96x256xbf16, #tpu.memory_space<vmem>>, vector<32x128xbf16>
    %c0_8 = arith.constant 0 : index
    %c0_9 = arith.constant 0 : index
    %25 = vector.load %arg10[%c0_8, %c0_9] : memref<96x256xbf16, #tpu.memory_space<vmem>>, vector<32x256xbf16>
    %c32_10 = arith.constant 32 : index
    %c0_11 = arith.constant 0 : index
    %26 = vector.load %arg10[%c32_10, %c0_11] : memref<96x256xbf16, #tpu.memory_space<vmem>>, vector<32x256xbf16>
    %cst_12 = arith.constant dense<0.000000e+00> : vector<256x128xf32>
    %27 = tpu.matmul %25, %24, %cst_12 {dimension_numbers = #tpu.dot_dimension_numbers<[0], [0], [1], [1], [0, 1, 1, 1], [], []>} : vector<32x256xbf16>, vector<32x128xbf16>, vector<256x128xf32> -> vector<256x128xf32>
    %cst_13 = arith.constant dense<0xFF800000> : vector<128xf32>
    %28 = vector.multi_reduction <maximumf>, %27, %cst_13 [0] : vector<256x128xf32> to vector<128xf32>
    %29 = vector.shape_cast %28 : vector<128xf32> to vector<1x128xf32>
    %30 = vector.broadcast %29 : vector<1x128xf32> to vector<256x128xf32>
    %31 = arith.subf %27, %30 : vector<256x128xf32>
    %32 = math.exp %31 : vector<256x128xf32>
    %cst_14 = arith.constant dense<0.000000e+00> : vector<128xf32>
    %33 = vector.multi_reduction <add>, %32, %cst_14 [0] : vector<256x128xf32> to vector<128xf32>
    %34 = vector.shape_cast %33 : vector<128xf32> to vector<1x128xf32>
    %35 = arith.truncf %32 : vector<256x128xf32> to vector<256x128xbf16>
    %cst_15 = arith.constant dense<0.000000e+00> : vector<32x128xf32>
    %36 = tpu.matmul %26, %35, %cst_15 {dimension_numbers = #tpu.dot_dimension_numbers<[1], [0], [0], [1], [0, 0, 1, 1], [], []>} : vector<32x256xbf16>, vector<256x128xbf16>, vector<32x128xf32> -> vector<32x128xf32>
    %cst_16 = arith.constant 1.000000e+00 : f32
    %37 = vector.broadcast %cst_16 : f32 to vector<1x128xf32>
    %38 = arith.divf %37, %34 : vector<1x128xf32>
    %39 = vector.broadcast %38 : vector<1x128xf32> to vector<32x128xf32>
    %40 = arith.mulf %36, %39 : vector<32x128xf32>
    %c0_17 = arith.constant 0 : index
    %c0_18 = arith.constant 0 : index
    %c0_19 = arith.constant 0 : index
    %c0_20 = arith.constant 0 : index
    %41 = vector.load %arg9[%c0_17, %c0_18, %c0_19, %c0_20] : memref<1x2x32x128xf32, #tpu.memory_space<vmem>>, vector<1x1x32x128xf32>
    %42 = vector.shape_cast %41 : vector<1x1x32x128xf32> to vector<32x128xf32>
    %43 = vector.shape_cast %22 : vector<32x128xf32> to vector<1x1x32x128xf32>
    tpu.vector_store %arg9[%c0_17, %c0_18, %c0_19, %c0_20], %43 {strides = array<i32>} : memref<1x2x32x128xf32, #tpu.memory_space<vmem>>, vector<1x1x32x128xf32>,
    %c0_21 = arith.constant 0 : index
    %c1 = arith.constant 1 : index
    %c0_22 = arith.constant 0 : index
    %c0_23 = arith.constant 0 : index
    %44 = vector.load %arg9[%c0_21, %c1, %c0_22, %c0_23] : memref<1x2x32x128xf32, #tpu.memory_space<vmem>>, vector<1x1x32x128xf32>
    %45 = vector.shape_cast %44 : vector<1x1x32x128xf32> to vector<32x128xf32>
    %46 = vector.shape_cast %40 : vector<32x128xf32> to vector<1x1x32x128xf32>
    tpu.vector_store %arg9[%c0_21, %c1, %c0_22, %c0_23], %46 {strides = array<i32>} : memref<1x2x32x128xf32, #tpu.memory_space<vmem>>, vector<1x1x32x128xf32>,
    %47 = arith.addf %22, %40 : vector<32x128xf32>
    %c0_24 = arith.constant 0 : index
    %c0_25 = arith.constant 0 : index
    %c0_26 = arith.constant 0 : index
    %48 = vector.load %arg8[%c0_24, %c0_25, %c0_26] : memref<1x32x128xf32, #tpu.memory_space<vmem>>, vector<1x32x128xf32>
    %49 = vector.shape_cast %48 : vector<1x32x128xf32> to vector<32x128xf32>
    %50 = vector.shape_cast %47 : vector<32x128xf32> to vector<1x32x128xf32>
    tpu.vector_store %arg8[%c0_24, %c0_25, %c0_26], %50 {strides = array<i32>} : memref<1x32x128xf32, #tpu.memory_space<vmem>>, vector<1x32x128xf32>,
    return
  }
  func.func @transform_0(%arg0: i32, %arg1: i32) -> (i32, i32, i32) {
    %c0_i32 = arith.constant 0 : i32
    %c0_i32_0 = arith.constant 0 : i32
    %c0_i32_1 = arith.constant 0 : i32
    return %arg0, %c0_i32, %c0_i32_0 : i32, i32, i32
  }
  func.func @transform_1(%arg0: i32, %arg1: i32) -> (i32, i32, i32) {
    %c0_i32 = arith.constant 0 : i32
    %c0_i32_0 = arith.constant 0 : i32
    %c0_i32_1 = arith.constant 0 : i32
    return %arg0, %c0_i32, %c0_i32_0 : i32, i32, i32
  }
  func.func @transform_2(%arg0: i32, %arg1: i32) -> (i32, i32) {
    %c0_i32 = arith.constant 0 : i32
    %c0_i32_0 = arith.constant 0 : i32
    %c0_i32_1 = arith.constant 0 : i32
    return %c0_i32, %c0_i32_0 : i32, i32
  }
  func.func @transform_3(%arg0: i32, %arg1: i32) -> (i32, i32) {
    %c0_i32 = arith.constant 0 : i32
    %c0_i32_0 = arith.constant 0 : i32
    %c0_i32_1 = arith.constant 0 : i32
    return %c0_i32, %c0_i32_0 : i32, i32
  }
  func.func @transform_4(%arg0: i32, %arg1: i32) -> (i32, i32) {
    %c0_i32 = arith.constant 0 : i32
    %c0_i32_0 = arith.constant 0 : i32
    %c0_i32_1 = arith.constant 0 : i32
    return %c0_i32, %c0_i32_0 : i32, i32
  }
  func.func @transform_5(%arg0: i32, %arg1: i32) -> (i32, i32) {
    %c0_i32 = arith.constant 0 : i32
    %c0_i32_0 = arith.constant 0 : i32
    %c0_i32_1 = arith.constant 0 : i32
    return %c0_i32, %c0_i32_0 : i32, i32
  }
  func.func @transform_6(%arg0: i32, %arg1: i32) -> (i32, i32, i32) {
    %c0_i32 = arith.constant 0 : i32
    %c0_i32_0 = arith.constant 0 : i32
    return %arg0, %c0_i32, %arg1 : i32, i32, i32
  }
  func.func @transform_7(%arg0: i32, %arg1: i32) -> (i32, i32, i32, i32) {
    %c0_i32 = arith.constant 0 : i32
    %c0_i32_0 = arith.constant 0 : i32
    %c0_i32_1 = arith.constant 0 : i32
    return %arg0, %c0_i32, %c0_i32_0, %arg1 : i32, i32, i32, i32
  }
}

</mosaic_0001>

<bundles_post_ra>
// kernel: cross_attention_forward.1
= control target key start
LH: loop header
LB: loop body
LE: loop exit
PB: predicated region body
PF: predicated region fallthrough
CT: control target
= control target key end

     0   :  { %s2552_s24 = smov 0   ;;  %s2554_s25 = smov 0   ;;  %s3349_s0 = inlined_call_operand.vmem [shape: f32[2,32,256], index: 0, kind: input, shape index: {}]   ;;  %s3350_s1 = inlined_call_operand.vmem [shape: f32[2,32,256], index: 1, kind: input, shape index: {}]   ;;  %s3351_s2 = inlined_call_operand.vmem [shape: bf16[96,32], index: 2, kind: input, shape index: {}]   ;;  %s3352_s3 = inlined_call_operand.vmem [shape: f32[96,1], index: 3, kind: input, shape index: {}]   ;;  %s3353_s4 = inlined_call_operand.vmem [shape: bf16[96,32], index: 4, kind: input, shape index: {}]   ;;  %s3354_s5 = inlined_call_operand.vmem [shape: f32[96,1], index: 5, kind: input, shape index: {}]   ;;  %s3355_s6 = inlined_call_operand.vmem [shape: f32[2,32,256], index: 6, kind: output, shape index: {0}]   ;;  %s3356_s7 = inlined_call_operand.vmem [shape: f32[2,2,32,256], index: 7, kind: output, shape index: {1}]  }
   0x1   :  { %s2556_s26 = smov 0   ;;  %s2558_s27 = smov 0  }
   0x2   :  { %s2560_s28 = smov 0   ;;  %s2562_s29 = smov 0  }
   0x3   :  { %s2564_s30 = smov 0  }
   0x4 LB: > { %s27_s8 = sadd.s32 1, %s2501_s28  ;;  %s30_s9 = sadd.s32 1, %s2505_s29  ;;  %s2509_s30 = sphi %s2564_s30, %s18_s30   ;;  %s2505_s29 = sphi %s2562_s29, %s3366_s29   ;;  %s2501_s28 = sphi %s2560_s28, %s3365_s28   ;;  %s2497_s27 = sphi %s2558_s27, %s3364_s27   ;;  %s2493_s26 = sphi %s2556_s26, %s3363_s26   ;;  %s2489_s25 = sphi %s2554_s25, %s3362_s25   ;;  %s2485_s24 = sphi %s2552_s24, %s3361_s24  }
   0x5   : > { %p28_p0 = scmp.ge.s32.totalorder %s27_s8, 2  ;;  %s2013_s10 = sadd.s32 4294967295, %s2509_s30  }
   0x6   : > { %p185_p1 = scmp.ne.s32.totalorder %s2489_s25, %s2485_s24  ;;  %p186_p2 = scmp.eq.s32.totalorder %s2013_s10, 3 }
   0x7   : > { %s3368_s8 = smov (%p28_p0, %s27_s8), 0  ;;  %s3370_s9 = smov (!%p28_p0, %s30_s9), %s2505_s29 }
   0x8   : > { %s171_s11 = ssub.s32 %s2501_s28, %s3368_s8  ;;  %p32_p3 = scmp.ge.s32.totalorder %s3370_s9, 2 }
   0x9   : > { %p2017_p4 = scmp.ge.s32.totalorder %s2509_s30, 1  ;;  %p2598_p5 = por %p186_p2, %p185_p1 }
   0xa   : > { %p266_p6 = scmp.lt.s32.totalorder %s2509_s30, 5  ;;  %s3372_s9 = smov (%p32_p3, %s3370_s9), 0 }
   0xb   : > { %3359 = sst [smem:[#allocation6_spill]] %s3372_s9  ;;  %s170_s13 = ssub.s32 %s2505_s29, %s3372_s9 }
   0xc   : > { %p267_p7 = pnand %p2017_p4, %p266_p6  ;;  %s172_s14 = sor.u32 %s171_s11, %s170_s13 }
   0xd   : > { %s175_s15 = sadd.s32 1, %s2489_s25  ;;  %p173_p8 = scmp.eq.s32.totalorder %s172_s14, 0 }
   0xe   : > { %270 = sbr.rel (%p267_p7) target bundleno = 1330 (0x532), region = 44  ;;  %s297_s17 = sand.u32 (!%p267_p7), 1, %s2485_s24  }
   0xf   : > { %s2609_s16 = scalar_select %p173_p8, %s2489_s25, %s175_s15  }
  0x10   : > { %p306_p9 = scmp.lt.s32.totalorder (!%p267_p7), %s2497_s27, 1  ;;  %s2018_s18 = sshll.u32 (!%p267_p7), %s297_s17, 5 }
  0x11   : > { %s2019_s19 = sshll.u32 (!%p267_p7), %s297_s17, 6  ;;  %s2624_s15 = scalar_lea.vmem (!%p267_p7), [#allocation4], %s2018_s18 }
  0x12   : > { %s2626_s9 = scalar_lea.vmem (!%p267_p7), [#allocation5], %s2019_s19  ;;  %p2024_p10 = scmp.ne.s32.totalorder (!%p267_p7), %s2493_s26, 0 }
  0x13   : > { %s307_s20 = scalar_select %p306_p9, %s2497_s27, 1 }
  0x14   : > { %320 = sbr.rel (%p2024_p10) target bundleno = 261 (0x105), region = 48 }
  0x15   : > { %s2224_s21 = sshll.u32 %s307_s20, 6 }
  0x16   : > { %s2617_s10 = scalar_lea.vmem %s3349_s0, %s2224_s21  ;;  %s2622_s14 = scalar_lea.vmem %s3350_s1, %s2224_s21 }
  0x19   : > { %v345_v0 = vld [vmem:[%s3352_s3] sm:$0xff]  ;;  %v574_v2 = vld [vmem:[%s2622_s14 + $0x30] sm:$0xff]  ;;  %v2511_v3 = vmov 0   ;;  %v573_v5 = vld [vmem:[%s2622_s14 + $0x28] sm:$0xff]  ;;  %vm447_vm0 = vcmask 261120  }
  0x1a   : > { %v572_v1 = vld [vmem:[%s2622_s14 + $0x20] sm:$0xff]  ;;  %2320 = vset.pattern.permute.xlu0 %v2511_v3  ;;  %2321 = vset.pattern.permute.xlu1 %v2511_v3  ;;  %v575_v6 = vld [vmem:[%s2622_s14 + $0x38] sm:$0xff]  ;;  %v347_v7 = vld [vmem:[%s3352_s3 + $0x10] sm:$0xff] }
  0x1b   : > { %v578_v4 = vpack.c.bf16 %v574_v2, %v572_v1  ;;  %359 = vperm.xlu0 %2320, %v345_v0   ;;  %v579_v8 = vpack.c.bf16 %v575_v6, %v573_v5  ;;  %369 = vperm.xlu1 %2321, %v347_v7   ;;  %v325_v9 = vld [vmem:[%s2617_s10 + $0x20] sm:$0xff]  ;;  %v327_v10 = vld [vmem:[%s2617_s10 + $0x30] sm:$0xff]  ;;  %v326_v11 = vld [vmem:[%s2617_s10 + $0x28] sm:$0xff] }
  0x1c   : > { %v331_v12 = vpack.c.bf16 %v327_v10, %v325_v9  ;;  %v328_v13 = vld [vmem:[%s2617_s10 + $0x38] sm:$0xff]  ;;  %v321_v14 = vld [vmem:[%s2617_s10] sm:$0xff]  ;;  %v323_v15 = vld [vmem:[%s2617_s10 + $0x10] sm:$0xff]  ;;  %2322 = vset.pattern.permute.xlu2 %v2511_v3 }
  0x1d   : > { %718 = vmatpush.bf16.msra.mxu2 %v578_v4  ;;  %757 = vmatpush.bf16.msra.mxu3 %v579_v8  ;;  %v332_v16 = vpack.c.bf16 %v328_v13, %v326_v11  ;;  %v322_v17 = vld [vmem:[%s2617_s10 + $0x8] sm:$0xff]  ;;  %v324_v18 = vld [vmem:[%s2617_s10 + $0x18] sm:$0xff]  ;;  %v568_v19 = vld [vmem:[%s2622_s14] sm:$0xff]  ;;  %v329_v20 = vpack.c.bf16 %v323_v15, %v321_v14 }
  0x1e   : > { %472 = vmatpush.bf16.msra.mxu0 %v331_v12  ;;  %v570_v21 = vld [vmem:[%s2622_s14 + $0x10] sm:$0xff]  ;;  %v569_v22 = vld [vmem:[%s2622_s14 + $0x8] sm:$0xff]  ;;  %v571_v23 = vld [vmem:[%s2622_s14 + $0x18] sm:$0xff]  ;;  %v330_v24 = vpack.c.bf16 %v324_v18, %v322_v17 }
  0x1f   : > { %511 = vmatpush.bf16.msra.mxu1 %v332_v16  ;;  %v576_v25 = vpack.c.bf16 %v570_v21, %v568_v19  ;;  %v577_v26 = vpack.c.bf16 %v571_v23, %v569_v22  ;;  %v2232_v27 = vld [vmem:[%s3353_s4] sm:$0xff]  ;;  %v346_v28 = vld [vmem:[%s3352_s3 + $0x8] sm:$0xff]  ;;  %v348_v30 = vld [vmem:[%s3352_s3 + $0x18] sm:$0xff] }
  0x20   : > { %v2226_v29 = vld [vmem:[%s3351_s2] sm:$0xff]  ;;  %v351_v32 = vld [vmem:[%s3352_s3 + $0x30] sm:$0xff]  ;;  %v352_v33 = vld [vmem:[%s3352_s3 + $0x38] sm:$0xff] }
  0x21   : > { %719 = vmatpush.bf16.msra.mxu2 %v576_v25  ;;  %758 = vmatpush.bf16.msra.mxu3 %v577_v26  ;;  %v349_v31 = vld [vmem:[%s3352_s3 + $0x20] sm:$0xff]  ;;  %v350_v34 = vld [vmem:[%s3352_s3 + $0x28] sm:$0xff]  ;;  %v355_v38 = vld [vmem:[%s3352_s3 + $0x50] sm:$0xff] }
  0x22   : > { %473 = vmatpush.bf16.msra.mxu0 %v329_v20  ;;  %379 = vperm.xlu2 %2322, %v349_v31   ;;  %v2233_v35 = vld [vmem:[%s3353_s4 + $0x8] sm:$0xff]  ;;  %v353_v39 = vld [vmem:[%s3352_s3 + $0x40] sm:$0xff]  ;;  %v356_v42 = vld [vmem:[%s3352_s3 + $0x58] sm:$0xff] }
  0x23   : > { %512 = vmatpush.bf16.msra.mxu1 %v330_v24  ;;  %364 = vperm.xlu0 %2320, %v346_v28   ;;  %v354_v36 = vld [vmem:[%s3352_s3 + $0x48] sm:$0xff]  ;;  %v592_v40 = vld [vmem:[%s3354_s5] sm:$0xff]  ;;  %v2234_v43 = vld [vmem:[%s3353_s4 + $0x10] sm:$0xff] }
  0x24   : > { %2085 = vmatmul.msk.bf16.vlgmr.msra.gmra.mxu2 %vm447_vm0, %v2232_v27  ;;  %2091 = vmatmul.msk.bf16.vlgmr.msra.gmra.mxu3 %vm447_vm0, %v2232_v27  ;;  %v2227_v37 = vld [vmem:[%s3351_s2 + $0x8] sm:$0xff]  ;;  %v595_v44 = vld [vmem:[%s3354_s5 + $0x18] sm:$0xff]  ;;  %v2228_v45 = vld [vmem:[%s3351_s2 + $0x10] sm:$0xff] }
  0x25   : > { %2049 = vmatmul.msk.bf16.vlgmr.msra.gmra.mxu0 %vm447_vm0, %v2226_v29  ;;  %374 = vperm.xlu1 %2321, %v348_v30   ;;  %v593_v41 = vld [vmem:[%s3354_s5 + $0x8] sm:$0xff]  ;;  %v596_v46 = vld [vmem:[%s3354_s5 + $0x20] sm:$0xff]  ;;  %v594_v47 = vld [vmem:[%s3354_s5 + $0x10] sm:$0xff] }
  0x26   : > { %2055 = vmatmul.msk.bf16.vlgmr.msra.gmra.mxu1 %vm447_vm0, %v2226_v29  ;;  %v598_v48 = vld [vmem:[%s3354_s5 + $0x30] sm:$0xff]  ;;  %v599_v49 = vld [vmem:[%s3354_s5 + $0x38] sm:$0xff]  ;;  %v597_v50 = vld [vmem:[%s3354_s5 + $0x28] sm:$0xff] }
  0x27   : > { %v2235_v51 = vld [vmem:[%s3353_s4 + $0x18] sm:$0xff]  ;;  %v601_v52 = vld [vmem:[%s3354_s5 + $0x48] sm:$0xff]  ;;  %v602_v54 = vld [vmem:[%s3354_s5 + $0x50] sm:$0xff] }
  0x28   : > { %v2229_v53 = vld [vmem:[%s3351_s2 + $0x18] sm:$0xff]  ;;  %v600_v55 = vld [vmem:[%s3354_s5 + $0x40] sm:$0xff]  ;;  %v2237_v59 = vld [vmem:[%s3353_s4 + $0x28] sm:$0xff] }
  0x29   : > { %v603_v56 = vld [vmem:[%s3354_s5 + $0x58] sm:$0xff]  ;;  %v2236_v57 = vld [vmem:[%s3353_s4 + $0x20] sm:$0xff]  ;;  %v2231_v60 = vld [vmem:[%s3351_s2 + $0x28] sm:$0xff] }
  0x2a   : > { %384 = vperm.xlu2 %2322, %v350_v34   ;;  %v2230_v58 = vld [vmem:[%s3351_s2 + $0x20] sm:$0xff] }
  0x2b   : > { %389 = vperm.xlu0 %2320, %v351_v32  }
  0x2d   : > { %394 = vperm.xlu1 %2321, %v352_v33  }
  0x32   : > { %399 = vperm.xlu2 %2322, %v353_v39  }
  0x33   : > { %404 = vperm.xlu0 %2320, %v354_v36  }
  0x34   : > { %2086 = vmatmul.msk.bf16.gmra.mxu2 %vm447_vm0, %v2233_v35  ;;  %2092 = vmatmul.msk.bf16.gmra.mxu3 %vm447_vm0, %v2233_v35 }
  0x35   : > { %2050 = vmatmul.msk.bf16.gmra.mxu0 %vm447_vm0, %v2227_v37  ;;  %409 = vperm.xlu1 %2321, %v355_v38  }
  0x36   : > { %2056 = vmatmul.msk.bf16.gmra.mxu1 %vm447_vm0, %v2227_v37 }
  0x3a   : > { %414 = vperm.xlu2 %2322, %v356_v42  }
  0x3b   : > { %606 = vperm.xlu0 %2320, %v592_v40  }
  0x3d   : > { %611 = vperm.xlu1 %2321, %v593_v41  }
  0x42   : > { %616 = vperm.xlu2 %2322, %v594_v47  }
  0x43   : > { %621 = vperm.xlu0 %2320, %v595_v44  }
  0x44   : > { %2087 = vmatmul.msk.bf16.gmra.mxu2 %vm447_vm0, %v2234_v43  ;;  %2093 = vmatmul.msk.bf16.gmra.mxu3 %vm447_vm0, %v2234_v43 }
  0x45   : > { %2051 = vmatmul.msk.bf16.gmra.mxu0 %vm447_vm0, %v2228_v45  ;;  %626 = vperm.xlu1 %2321, %v596_v46  }
  0x46   : > { %2057 = vmatmul.msk.bf16.gmra.mxu1 %vm447_vm0, %v2228_v45 }
  0x4a   : > { %631 = vperm.xlu2 %2322, %v597_v50  }
  0x4b   : > { %636 = vperm.xlu0 %2320, %v598_v48  }
  0x4d   : > { %641 = vperm.xlu1 %2321, %v599_v49  }
  0x52   : > { %646 = vperm.xlu2 %2322, %v600_v55  }
  0x53   : > { %651 = vperm.xlu0 %2320, %v601_v52  }
  0x54   : > { %2088 = vmatmul.msk.bf16.gmra.mxu2 %vm447_vm0, %v2235_v51  ;;  %2094 = vmatmul.msk.bf16.gmra.mxu3 %vm447_vm0, %v2235_v51 }
  0x55   : > { %2052 = vmatmul.msk.bf16.gmra.mxu0 %vm447_vm0, %v2229_v53  ;;  %656 = vperm.xlu1 %2321, %v602_v54  }
  0x56   : > { %2058 = vmatmul.msk.bf16.gmra.mxu1 %vm447_vm0, %v2229_v53 }
  0x5a   : > { %661 = vperm.xlu2 %2322, %v603_v56  }
  0x64   : > { %2089 = vmatmul.msk.bf16.gmra.mxu2 %vm447_vm0, %v2236_v57  ;;  %2095 = vmatmul.msk.bf16.gmra.mxu3 %vm447_vm0, %v2236_v57 }
  0x65   : > { %2053 = vmatmul.msk.bf16.gmra.mxu0 %vm447_vm0, %v2230_v58 }
  0x66   : > { %2059 = vmatmul.msk.bf16.gmra.mxu1 %vm447_vm0, %v2230_v58 }
  0x74   : > { %2090 = vmatmul.msk.bf16.gmra.mxu2 %vm447_vm0, %v2237_v59  ;;  %2096 = vmatmul.msk.bf16.gmra.mxu3 %vm447_vm0, %v2237_v59 }
  0x75   : > { %2054 = vmatmul.msk.bf16.gmra.mxu0 %vm447_vm0, %v2231_v60 }
  0x76   : > { %2060 = vmatmul.msk.bf16.gmra.mxu1 %vm447_vm0, %v2231_v60 }
  0x7c   : > { %v2777_v63 = vpop.permute.xlu2 %379 }
  0x84   : > { %v2779_v2 = vpop.permute.xlu2 %384 }
  0x8c   : > { %v2785_v5 = vpop.permute.xlu2 %399 }
  0x8d   : > { %v360_v61 = vpop.permute.xlu0 %359  ;;  %v370_v62 = vpop.permute.xlu1 %369 }
  0x94   : > { %v2791_v18 = vpop.permute.xlu2 %414 }
  0x95   : > { %v365_v0 = vpop.permute.xlu0 %364 }
  0x97   : > { %v375_v1 = vpop.permute.xlu1 %374 }
  0x9c   : > { %v617_v35 = vpop.permute.xlu2 %616 }
  0x9d   : > { %v2781_v3 = vpop.permute.xlu0 %389 }
  0x9f   : > { %v2783_v4 = vpop.permute.xlu1 %394 }
  0xa2   : > { %v475_v6 = vpop.f32.mrf.mxu0 }
  0xa3   : > { %v476_v7 = vadd.f32 %v475_v6, %v360_v61  ;;  %v514_v8 = vpop.f32.mrf.mxu1 }
  0xa4   : > { %v515_v9 = vadd.f32 %v514_v8, %v360_v61 }
  0xa5   : > { %v2787_v10 = vpop.permute.xlu0 %404 }
  0xa6   : > { %v544_v11 = vpack.c.bf16 %v515_v9, %v476_v7  ;;  %v632_v9 = vpop.permute.xlu2 %631 }
  0xa7   : > { %v721_v12 = vpop.f32.mrf.mxu2  ;;  %v760_v13 = vpop.f32.mrf.mxu3 }
  0xa8   : > { %556 = vst [vmem:[#allocation2] sm:$0xff] %v544_v11  ;;  %v2789_v14 = vpop.permute.xlu1 %409 }
  0xaa   : > { %v477_v15 = vpop.f32.mrf.mxu0 }
  0xab   : > { %v478_v16 = vadd.f32 %v477_v15, %v365_v0  ;;  %v516_v17 = vpop.f32.mrf.mxu1 }
  0xac   : > { %v517_v19 = vadd.f32 %v516_v17, %v365_v0 }
  0xad   : > { %v607_v20 = vpop.permute.xlu0 %606 }
  0xae   : > { %v545_v21 = vpack.c.bf16 %v517_v19, %v478_v16  ;;  %v722_v22 = vadd.f32 %v721_v12, %v607_v20  ;;  %v761_v23 = vadd.f32 %v760_v13, %v607_v20 }
  0xaf   : > { %v723_v24 = vpop.f32.mrf.mxu2  ;;  %v762_v25 = vpop.f32.mrf.mxu3 }
  0xb0   : > { %557 = vst [vmem:[#allocation2 + $0x8] sm:$0xff] %v545_v21  ;;  %v790_v26 = vpack.c.bf16 %v761_v23, %v722_v22  ;;  %v612_v27 = vpop.permute.xlu1 %611 }
  0xb1   : > { %v724_v28 = vadd.f32 %v723_v24, %v612_v27  ;;  %v763_v29 = vadd.f32 %v762_v25, %v612_v27 }
  0xb2   : > { %802 = vst [vmem:[#allocation3] sm:$0xff] %v790_v26  ;;  %v480_v30 = vpop.f32.mrf.mxu0 }
  0xb3   : > { %v791_v31 = vpack.c.bf16 %v763_v29, %v724_v28  ;;  %v481_v32 = vadd.f32 %v480_v30, %v370_v62  ;;  %v519_v33 = vpop.f32.mrf.mxu1 }
  0xb4   : > { %v520_v34 = vadd.f32 %v519_v33, %v370_v62 }
  0xb5   : > { %803 = vst [vmem:[#allocation3 + $0x8] sm:$0xff] %v791_v31  ;;  %v622_v46 = vpop.permute.xlu0 %621 }
  0xb6   : > { %v546_v36 = vpack.c.bf16 %v520_v34, %v481_v32 }
  0xb7   : > { %v726_v37 = vpop.f32.mrf.mxu2  ;;  %v765_v38 = vpop.f32.mrf.mxu3 }
  0xb8   : > { %558 = vst [vmem:[#allocation2 + $0x10] sm:$0xff] %v546_v36  ;;  %v727_v39 = vadd.f32 %v726_v37, %v617_v35  ;;  %v766_v40 = vadd.f32 %v765_v38, %v617_v35  ;;  %v627_v57 = vpop.permute.xlu1 %626 }
  0xba   : > { %v792_v41 = vpack.c.bf16 %v766_v40, %v727_v39  ;;  %v482_v42 = vpop.f32.mrf.mxu0 }
  0xbb   : > { %v483_v43 = vadd.f32 %v482_v42, %v375_v1  ;;  %v521_v44 = vpop.f32.mrf.mxu1  ;;  %v647_v42 = vpop.permute.xlu2 %646 }
  0xbc   : > { %804 = vst [vmem:[#allocation3 + $0x10] sm:$0xff] %v792_v41  ;;  %v522_v45 = vadd.f32 %v521_v44, %v375_v1 }
  0xbd   : > { %v637_v22 = vpop.permute.xlu0 %636 }
  0xbe   : > { %v547_v47 = vpack.c.bf16 %v522_v45, %v483_v43 }
  0xbf   : > { %v728_v48 = vpop.f32.mrf.mxu2  ;;  %v767_v49 = vpop.f32.mrf.mxu3 }
  0xc0   : > { %559 = vst [vmem:[#allocation2 + $0x18] sm:$0xff] %v547_v47  ;;  %v729_v50 = vadd.f32 %v728_v48, %v622_v46  ;;  %v768_v51 = vadd.f32 %v767_v49, %v622_v46  ;;  %v642_v32 = vpop.permute.xlu1 %641 }
  0xc2   : > { %v793_v52 = vpack.c.bf16 %v768_v51, %v729_v50  ;;  %v485_v53 = vpop.f32.mrf.mxu0 }
  0xc3   : > { %v486_v54 = vadd.f32 %v485_v53, %v2777_v63  ;;  %v524_v55 = vpop.f32.mrf.mxu1 }
  0xc4   : > { %805 = vst [vmem:[#allocation3 + $0x18] sm:$0xff] %v793_v52  ;;  %v525_v56 = vadd.f32 %v524_v55, %v2777_v63 }
  0xc5   : > { %v652_v52 = vpop.permute.xlu0 %651 }
  0xc6   : > { %v548_v58 = vpack.c.bf16 %v525_v56, %v486_v54 }
  0xc7   : > { %v731_v59 = vpop.f32.mrf.mxu2  ;;  %v770_v60 = vpop.f32.mrf.mxu3 }
  0xc8   : > { %560 = vst [vmem:[#allocation2 + $0x20] sm:$0xff] %v548_v58  ;;  %v732_v61 = vadd.f32 %v731_v59, %v627_v57  ;;  %v771_v62 = vadd.f32 %v770_v60, %v627_v57 }
  0xca   : > { %v794_v0 = vpack.c.bf16 %v771_v62, %v732_v61  ;;  %v487_v1 = vpop.f32.mrf.mxu0  ;;  %v657_v62 = vpop.permute.xlu1 %656 }
  0xcb   : > { %v488_v6 = vadd.f32 %v487_v1, %v2779_v2  ;;  %v526_v7 = vpop.f32.mrf.mxu1 }
  0xcc   : > { %806 = vst [vmem:[#allocation3 + $0x20] sm:$0xff] %v794_v0  ;;  %v527_v8 = vadd.f32 %v526_v7, %v2779_v2 }
  0xce   : > { %v549_v11 = vpack.c.bf16 %v527_v8, %v488_v6 }
  0xcf   : > { %v733_v12 = vpop.f32.mrf.mxu2  ;;  %v772_v13 = vpop.f32.mrf.mxu3 }
  0xd0   : > { %561 = vst [vmem:[#allocation2 + $0x28] sm:$0xff] %v549_v11  ;;  %v734_v63 = vadd.f32 %v733_v12, %v632_v9  ;;  %v773_v15 = vadd.f32 %v772_v13, %v632_v9 }
  0xd2   : > { %v795_v16 = vpack.c.bf16 %v773_v15, %v734_v63  ;;  %v490_v17 = vpop.f32.mrf.mxu0  ;;  %v662_v63 = vpop.permute.xlu2 %661 }
  0xd3   : > { %v491_v19 = vadd.f32 %v490_v17, %v2781_v3  ;;  %v529_v20 = vpop.f32.mrf.mxu1 }
  0xd4   : > { %807 = vst [vmem:[#allocation3 + $0x28] sm:$0xff] %v795_v16  ;;  %v530_v21 = vadd.f32 %v529_v20, %v2781_v3 }
  0xd6   : > { %v550_v23 = vpack.c.bf16 %v530_v21, %v491_v19 }
  0xd7   : > { %v736_v24 = vpop.f32.mrf.mxu2  ;;  %v775_v25 = vpop.f32.mrf.mxu3 }
  0xd8   : > { %562 = vst [vmem:[#allocation2 + $0x30] sm:$0xff] %v550_v23  ;;  %v737_v2 = vadd.f32 %v736_v24, %v637_v22  ;;  %v776_v26 = vadd.f32 %v775_v25, %v637_v22 }
  0xda   : > { %v796_v27 = vpack.c.bf16 %v776_v26, %v737_v2  ;;  %v492_v28 = vpop.f32.mrf.mxu0 }
  0xdb   : > { %v493_v29 = vadd.f32 %v492_v28, %v2783_v4  ;;  %v531_v30 = vpop.f32.mrf.mxu1 }
  0xdc   : > { %808 = vst [vmem:[#allocation3 + $0x30] sm:$0xff] %v796_v27  ;;  %v532_v31 = vadd.f32 %v531_v30, %v2783_v4 }
  0xde   : > { %v551_v33 = vpack.c.bf16 %v532_v31, %v493_v29 }
  0xdf   : > { %v738_v34 = vpop.f32.mrf.mxu2  ;;  %v777_v35 = vpop.f32.mrf.mxu3 }
  0xe0   : > { %563 = vst [vmem:[#allocation2 + $0x38] sm:$0xff] %v551_v33  ;;  %v739_v3 = vadd.f32 %v738_v34, %v642_v32  ;;  %v778_v36 = vadd.f32 %v777_v35, %v642_v32 }
  0xe2   : > { %v797_v37 = vpack.c.bf16 %v778_v36, %v739_v3  ;;  %v495_v38 = vpop.f32.mrf.mxu0 }
  0xe3   : > { %v496_v39 = vadd.f32 %v495_v38, %v2785_v5  ;;  %v534_v40 = vpop.f32.mrf.mxu1 }
  0xe4   : > { %809 = vst [vmem:[#allocation3 + $0x38] sm:$0xff] %v797_v37  ;;  %v535_v41 = vadd.f32 %v534_v40, %v2785_v5 }
  0xe6   : > { %v552_v43 = vpack.c.bf16 %v535_v41, %v496_v39 }
  0xe7   : > { %v741_v44 = vpop.f32.mrf.mxu2  ;;  %v780_v45 = vpop.f32.mrf.mxu3 }
  0xe8   : > { %564 = vst [vmem:[#allocation2 + $0x40] sm:$0xff] %v552_v43  ;;  %v742_v4 = vadd.f32 %v741_v44, %v647_v42  ;;  %v781_v46 = vadd.f32 %v780_v45, %v647_v42 }
  0xea   : > { %v798_v47 = vpack.c.bf16 %v781_v46, %v742_v4  ;;  %v497_v48 = vpop.f32.mrf.mxu0 }
  0xeb   : > { %v498_v49 = vadd.f32 %v497_v48, %v2787_v10  ;;  %v536_v50 = vpop.f32.mrf.mxu1 }
  0xec   : > { %810 = vst [vmem:[#allocation3 + $0x40] sm:$0xff] %v798_v47  ;;  %v537_v51 = vadd.f32 %v536_v50, %v2787_v10 }
  0xee   : > { %v553_v53 = vpack.c.bf16 %v537_v51, %v498_v49 }
  0xef   : > { %v743_v54 = vpop.f32.mrf.mxu2  ;;  %v782_v55 = vpop.f32.mrf.mxu3 }
  0xf0   : > { %565 = vst [vmem:[#allocation2 + $0x48] sm:$0xff] %v553_v53  ;;  %v744_v5 = vadd.f32 %v743_v54, %v652_v52  ;;  %v783_v56 = vadd.f32 %v782_v55, %v652_v52 }
  0xf2   : > { %v799_v57 = vpack.c.bf16 %v783_v56, %v744_v5  ;;  %v500_v58 = vpop.f32.mrf.mxu0 }
  0xf3   : > { %v501_v59 = vadd.f32 %v500_v58, %v2789_v14  ;;  %v539_v60 = vpop.f32.mrf.mxu1 }
  0xf4   : > { %811 = vst [vmem:[#allocation3 + $0x48] sm:$0xff] %v799_v57  ;;  %v540_v61 = vadd.f32 %v539_v60, %v2789_v14 }
  0xf6   : > { %v554_v0 = vpack.c.bf16 %v540_v61, %v501_v59 }
  0xf7   : > { %v746_v1 = vpop.f32.mrf.mxu2  ;;  %v785_v6 = vpop.f32.mrf.mxu3 }
  0xf8   : > { %566 = vst [vmem:[#allocation2 + $0x50] sm:$0xff] %v554_v0  ;;  %v747_v10 = vadd.f32 %v746_v1, %v657_v62  ;;  %v786_v7 = vadd.f32 %v785_v6, %v657_v62 }
  0xfa   : > { %v800_v8 = vpack.c.bf16 %v786_v7, %v747_v10  ;;  %v502_v9 = vpop.f32.mrf.mxu0 }
  0xfb   : > { %v503_v11 = vadd.f32 %v502_v9, %v2791_v18  ;;  %v541_v12 = vpop.f32.mrf.mxu1 }
  0xfc   : > { %812 = vst [vmem:[#allocation3 + $0x50] sm:$0xff] %v800_v8  ;;  %v542_v13 = vadd.f32 %v541_v12, %v2791_v18 }
  0xfe   : > { %v555_v15 = vpack.c.bf16 %v542_v13, %v503_v11 }
  0xff   : > { %v748_v16 = vpop.f32.mrf.mxu2  ;;  %v787_v17 = vpop.f32.mrf.mxu3 }
 0x100   : > { %567 = vst [vmem:[#allocation2 + $0x58] sm:$0xff] %v555_v15  ;;  %v749_v14 = vadd.f32 %v748_v16, %v662_v63  ;;  %v788_v19 = vadd.f32 %v787_v17, %v662_v63 }
 0x102   : > { %v801_v20 = vpack.c.bf16 %v788_v19, %v749_v14 }
 0x104   : > { %813 = vst [vmem:[#allocation3 + $0x58] sm:$0xff] %v801_v20 }
 0x105 PF: > { %v2240_v21 = vld [vmem:[#allocation3 + $0x4] sm:$0xf]  ;;  %v2101_v22 = vld [vmem:[#allocation3] sm:$0xf]  ;;  %v2103_v23 = vld [vmem:[#allocation3 + $0x8] sm:$0xf0] }
 0x106   : > { %v2241_v24 = vld [vmem:[#allocation3 + $0x4] sm:$0xf0]  ;;  %v2106_v25 = vor.u32 %v2240_v21, %v2103_v23  ;;  %v2250_v26 = vld [vmem:[#allocation2 + $0x4] sm:$0xf]  ;;  %v2158_v27 = vld [vmem:[#allocation2] sm:$0xf] }
 0x107   : > { %v2102_v2 = vor.u32 %v2241_v24, %v2101_v22  ;;  %v2160_v18 = vld [vmem:[#allocation2 + $0x8] sm:$0xf0]  ;;  %v2251_v28 = vld [vmem:[#allocation2 + $0x4] sm:$0xf0]  ;;  %s2097_s24 = sshll.u32 %s2493_s26, 7  ;;  %vm887_vm1 = vcmask 261120  }
 0x108   : > { %v2159_v29 = vor.u32 %v2251_v28, %v2158_v27  ;;  %v2163_v30 = vor.u32 %v2250_v26, %v2160_v18  ;;  %s2810_s17 = sshra.s32 %s2097_s24, 7  ;;  %v2242_v3 = vld [vmem:[#allocation3 + $0x14] sm:$0xf]  ;;  %v2109_v37 = vld [vmem:[#allocation3 + $0x10] sm:$0xf]  ;;  %s2218_s21 = sshll.u32 (%p2598_p5), %s2497_s27, 3 }
 0x109   : > { %851 = vxpose.binary.xlu0.c.b16.start [1/4] (short) %v2106_v25, %v2102_v2, 128  ;;  %s2098_s18 = sshll.u32 %s2810_s17, 2  ;;  %v2111_v38 = vld [vmem:[#allocation3 + $0x18] sm:$0xf0]  ;;  %v2243_v39 = vld [vmem:[#allocation3 + $0x14] sm:$0xf0]  ;;  %s1787_s22 = sadd.s32 (%p2598_p5), %s2493_s26, %s2218_s21 }
 0x10a   : > { %1322 = vxpose.binary.xlu1.c.b16.start [1/4] (short) %v2163_v30, %v2159_v29, 128  ;;  %s818_s19 = scalar_lea.vmem [#allocation2], %s2098_s18  ;;  %v2252_v40 = vld [vmem:[#allocation2 + $0x14] sm:$0xf]  ;;  %v2166_v41 = vld [vmem:[#allocation2 + $0x10] sm:$0xf]  ;;  %v2110_v44 = vor.u32 %v2243_v39, %v2109_v37  ;;  %v2114_v45 = vor.u32 %v2242_v3, %v2111_v38  ;;  %s1289_s20 = scalar_lea.vmem [#allocation3], %s2098_s18 }
 0x10b   : > { %v2121_v31 = vld [vmem:[%s818_s19 + $0x50] sm:$0xf]  ;;  %v2239_v32 = vld [vmem:[%s818_s19 + $0x54] sm:$0xf0]  ;;  %v2117_v33 = vld [vmem:[%s818_s19 + $0x40] sm:$0xf] }
 0x10c   : > { %v2122_v34 = vor.u32 %v2239_v32, %v2121_v31  ;;  %v2238_v35 = vld [vmem:[%s818_s19 + $0x44] sm:$0xf0]  ;;  %v2168_v42 = vld [vmem:[#allocation2 + $0x18] sm:$0xf0]  ;;  %v2253_v43 = vld [vmem:[#allocation2 + $0x14] sm:$0xf0] }
 0x10d   : > { %v2118_v36 = vor.u32 %v2238_v35, %v2117_v33  ;;  %v2167_v4 = vor.u32 %v2253_v43, %v2166_v41  ;;  %v2171_v46 = vor.u32 %v2252_v40, %v2168_v42  ;;  %v2178_v60 = vld [vmem:[%s1289_s20 + $0x50] sm:$0xf]  ;;  %v2249_v61 = vld [vmem:[%s1289_s20 + $0x54] sm:$0xf0]  ;;  %v2174_v6 = vld [vmem:[%s1289_s20 + $0x40] sm:$0xf] }
 0x10e   : > { %942 = vmatpush.bf16.msra.mxu0 %v2122_v34  ;;  %2258 = vmatpush.bf16.msra.mxu1 %v2122_v34  ;;  %v2829_v0 = vor.u32 %v2249_v61, %v2178_v60  ;;  %v2248_v10 = vld [vmem:[%s1289_s20 + $0x44] sm:$0xf0]  ;;  %s2219_s23 = sshll.u32 (%p2598_p5), %s1787_s22, 3 }
 0x10f   : > { %v2833_v7 = vor.u32 %v2248_v10, %v2174_v6  ;;  %s1789_s13 = scalar_lea.vmem (%p2598_p5), %s3355_s6, %s2219_s23 }
 0x110   : > { %2260 = vmatpush.bf16.msra.mxu3 %v2829_v0 }
 0x112   : > { %943 = vmatpush.bf16.msra.mxu0 %v2118_v36  ;;  %2259 = vmatpush.bf16.msra.mxu1 %v2118_v36 }
 0x114   : > { %2261 = vmatpush.bf16.msra.mxu3 %v2833_v7 }
 0x119   : > { %852 = vxpose.binary.xlu0.c.b16.end [2/4] (short) %v2114_v45, %v2110_v44, 128 }
 0x11a   : > { %1323 = vxpose.binary.xlu1.c.b16.end [2/4] (short) %v2171_v46, %v2167_v4, 128 }
 0x1b5   : > { %v859_v47 = vpop.trf.xlu0 }
 0x1b6   : > { %2123 = vmatmul.msk.bf16.vlgmr.msra.gmra.mxu0 %vm887_vm1, %v859_v47  ;;  %v2816_v48 = vpop.trf.xlu1 }
 0x1bd   : > { %v860_v49 = vpop.trf.xlu0 }
 0x1be   : > { %v1331_v50 = vpop.trf.xlu1 }
 0x1c5   : > { %v861_v51 = vpop.trf.xlu0 }
 0x1c6   : > { %2124 = vmatmul.msk.bf16.gmra.mxu0 %vm887_vm1, %v861_v51  ;;  %v2819_v52 = vpop.trf.xlu1 }
 0x1cd   : > { %v862_v53 = vpop.trf.xlu0 }
 0x1ce   : > { %v1333_v54 = vpop.trf.xlu1 }
 0x1d5   : > { %v863_v55 = vpop.trf.xlu0 }
 0x1d6   : > { %2125 = vmatmul.msk.bf16.gmra.mxu0 %vm887_vm1, %v863_v55  ;;  %v2822_v5 = vpop.trf.xlu1 }
 0x1dd   : > { %v864_v56 = vpop.trf.xlu0 }
 0x1de   : > { %v1335_v57 = vpop.trf.xlu1 }
 0x1e5   : > { %v865_v58 = vpop.trf.xlu0 }
 0x1e6   : > { %2126 = vmatmul.msk.bf16.gmra.mxu0 %vm887_vm1, %v865_v58  ;;  %v2825_v59 = vpop.trf.xlu1 }
 0x1ed   : > { %v866_v62 = vpop.trf.xlu0 }
 0x1ee   : > { %2134 = vmatmul.msk.bf16.vlgmr.msra.gmra.mxu1 %vm887_vm1, %v866_v62  ;;  %v1337_v1 = vpop.trf.xlu1 }
 0x1f5   : > { %v867_v8 = vpop.trf.xlu0 }
 0x1f6   : > { %2127 = vmatmul.msk.bf16.gmra.mxu0 %vm887_vm1, %v867_v8  ;;  %v2837_v9 = vpop.trf.xlu1 }
 0x1fd   : > { %v868_v11 = vpop.trf.xlu0 }
 0x1fe   : > { %2135 = vmatmul.msk.bf16.gmra.mxu1 %vm887_vm1, %v868_v11  ;;  %v1339_v12 = vpop.trf.xlu1 }
 0x205   : > { %v869_v13 = vpop.trf.xlu0 }
 0x206   : > { %2128 = vmatmul.msk.bf16.gmra.mxu0 %vm887_vm1, %v869_v13  ;;  %v1340_v63 = vpop.trf.xlu1 }
 0x207   : > { %2185 = vmatmul.msk.bf16.vlgmr.msra.gmra.mxu3 %vm887_vm1, %v1340_v63 }
 0x20d   : > { %v870_v15 = vpop.trf.xlu0 }
 0x20e   : > { %2136 = vmatmul.msk.bf16.gmra.mxu1 %vm887_vm1, %v870_v15  ;;  %v1341_v16 = vpop.trf.xlu1 }
 0x215   : > { %v871_v17 = vpop.trf.xlu0 }
 0x216   : > { %2129 = vmatmul.msk.bf16.gmra.mxu0 %vm887_vm1, %v871_v17  ;;  %v1342_v14 = vpop.trf.xlu1 }
 0x217   : > { %2186 = vmatmul.msk.bf16.gmra.mxu3 %vm887_vm1, %v1342_v14 }
 0x21d   : > { %v872_v19 = vpop.trf.xlu0 }
 0x21e   : > { %2137 = vmatmul.msk.bf16.gmra.mxu1 %vm887_vm1, %v872_v19  ;;  %v1343_v20 = vpop.trf.xlu1 }
 0x225   : > { %v873_v21 = vpop.trf.xlu0 }
 0x226   : > { %2130 = vmatmul.msk.bf16.gmra.mxu0 %vm887_vm1, %v873_v21  ;;  %v1344_v22 = vpop.trf.xlu1 }
 0x227   : > { %2187 = vmatmul.msk.bf16.gmra.mxu3 %vm887_vm1, %v1344_v22 }
 0x22d   : > { %v874_v23 = vpop.trf.xlu0 }
 0x22e   : > { %2138 = vmatmul.msk.bf16.gmra.mxu1 %vm887_vm1, %v874_v23 }
 0x233   : > { %v2849_v24 = vpop.f32.mrf.mxu0 }
 0x236   : > { %2131 = vmatmul.msk.bf16.gmra.mxu0 %vm887_vm1, %v860_v49 }
 0x237   : > { %2188 = vmatmul.msk.bf16.gmra.mxu3 %vm887_vm1, %v1331_v50 }
 0x23b   : > { %v2853_v25 = vpop.f32.mrf.mxu0 }
 0x243   : > { %v2855_v2 = vpop.f32.mrf.mxu0 }
 0x246   : > { %2132 = vmatmul.msk.bf16.gmra.mxu0 %vm887_vm1, %v862_v53 }
 0x247   : > { %2189 = vmatmul.msk.bf16.gmra.mxu3 %vm887_vm1, %v1333_v54 }
 0x24b   : > { %v2859_v26 = vpop.f32.mrf.mxu0 }
 0x253   : > { %v2861_v27 = vpop.f32.mrf.mxu0 }
 0x254   : > { %v1025_v53 = vmax.f32 %v2849_v24, %v2861_v27 }
 0x256   : > { %2133 = vmatmul.msk.bf16.gmra.mxu0 %vm887_vm1, %v864_v56 }
 0x257   : > { %2190 = vmatmul.msk.bf16.gmra.mxu3 %vm887_vm1, %v1335_v57 }
 0x25b   : > { %v2865_v18 = vpop.f32.mrf.mxu0 }
 0x25c   : > { %v1026_v62 = vmax.f32 %v2853_v25, %v2865_v18 }
 0x263   : > { %v2867_v28 = vpop.f32.mrf.mxu0 }
 0x264   : > { %v1027_v50 = vmax.f32 %v2855_v2, %v2867_v28 }
 0x267   : > { %2191 = vmatmul.msk.bf16.gmra.mxu3 %vm887_vm1, %v1337_v1 }
 0x26b   : > { %v2870_v29 = vpop.f32.mrf.mxu0  ;;  %v2877_v32 = vpop.f32.mrf.mxu1 }
 0x26c   : > { %v1028_v49 = vmax.f32 %v2859_v26, %v2870_v29 }
 0x273   : > { %v2872_v30 = vpop.f32.mrf.mxu0  ;;  %v2884_v35 = vpop.f32.mrf.mxu1 }
 0x274   : > { %v1029_v57 = vmax.f32 %v1025_v53, %v2872_v30 }
 0x277   : > { %2192 = vmatmul.msk.bf16.gmra.mxu3 %vm887_vm1, %v1339_v12 }
 0x27b   : > { %v2875_v31 = vpop.f32.mrf.mxu0  ;;  %v2888_v36 = vpop.f32.mrf.mxu1 }
 0x27c   : > { %v1030_v10 = vmax.f32 %v1026_v62, %v2875_v31 }
 0x283   : > { %v2879_v33 = vpop.f32.mrf.mxu0  ;;  %v2893_v38 = vpop.f32.mrf.mxu1 }
 0x284   : > { %v1031_v54 = vmax.f32 %v1027_v50, %v2879_v33 }
 0x287   : > { %2193 = vmatmul.msk.bf16.gmra.mxu3 %vm887_vm1, %v1341_v16 }
 0x28b   : > { %v2882_v34 = vpop.f32.mrf.mxu0  ;;  %v2897_v40 = vpop.f32.mrf.mxu1 }
 0x28c   : > { %v1032_v51 = vmax.f32 %v1028_v49, %v2882_v34 }
 0x293   : > { %v2886_v3 = vpop.f32.mrf.mxu0  ;;  %v2903_v43 = vpop.f32.mrf.mxu1 }
 0x294   : > { %v1033_v1 = vmax.f32 %v1029_v57, %v2886_v3 }
 0x297   : > { %2194 = vmatmul.msk.bf16.gmra.mxu3 %vm887_vm1, %v1343_v20 }
 0x29b   : > { %v2891_v37 = vpop.f32.mrf.mxu0  ;;  %v2907_v45 = vpop.f32.mrf.mxu1 }
 0x29c   : > { %v1034_v12 = vmax.f32 %v1030_v10, %v2891_v37 }
 0x2a3   : > { %v2895_v39 = vpop.f32.mrf.mxu0  ;;  %v2911_v46 = vpop.f32.mrf.mxu1 }
 0x2a4   : > { %v1035_v58 = vmax.f32 %v1031_v54, %v2895_v39 }
 0x2ab   : > { %v2899_v41 = vpop.f32.mrf.mxu0  ;;  %v2924_v56 = vpop.f32.mrf.mxu1 }
 0x2ac   : > { %v1036_v55 = vmax.f32 %v1032_v51, %v2899_v41 }
 0x2b3   : > { %v2901_v42 = vpop.f32.mrf.mxu0  ;;  %v2943_v17 = vpop.f32.mrf.mxu1 }
 0x2b4   : > { %v1037_v8 = vmax.f32 %v1033_v1, %v2901_v42 }
 0x2bb   : > { %v2905_v44 = vpop.f32.mrf.mxu0 }
 0x2bc   : > { %v1038_v15 = vmax.f32 %v1034_v12, %v2905_v44 }
 0x2c3   : > { %v2909_v4 = vpop.f32.mrf.mxu0 }
 0x2c4   : > { %v1039_v6 = vmax.f32 %v1035_v58, %v2909_v4 }
 0x2c6   : > { %v1043_v13 = vmax.f32 %v1039_v6, %v2877_v32 }
 0x2c8   : > { %v1047_v19 = vmax.f32 %v1043_v13, %v2897_v40 }
 0x2ca   : > { %v1051_v49 = vmax.f32 %v1047_v19, %v2924_v56 }
 0x2cb   : > { %v2913_v47 = vpop.f32.mrf.mxu0 }
 0x2cc   : > { %v1040_v60 = vmax.f32 %v1036_v55, %v2913_v47 }
 0x2ce   : > { %v1044_v11 = vmax.f32 %v1040_v60, %v2884_v35 }
 0x2d0   : > { %v1048_v16 = vmax.f32 %v1044_v11, %v2903_v43 }
 0x2d2   : > { %v1052_v22 = vmax.f32 %v1048_v16, %v2943_v17 }
 0x2d3   : > { %v2929_v61 = vpop.f32.mrf.mxu0 }
 0x2d4   : > { %v1041_v63 = vmax.f32 %v1037_v8, %v2929_v61  ;;  %v1054_v53 = vmax.f32 %v1051_v49, %v1052_v22 }
 0x2d6   : > { %v1045_v20 = vmax.f32 %v1041_v63, %v2888_v36 }
 0x2d8   : > { %v1049_v50 = vmax.f32 %v1045_v20, %v2907_v45 }
 0x2db   : > { %v2945_v14 = vpop.f32.mrf.mxu0 }
 0x2dc   : > { %v1042_v21 = vmax.f32 %v1038_v15, %v2945_v14 }
 0x2de   : > { %v1046_v23 = vmax.f32 %v1042_v21, %v2893_v38 }
 0x2e0   : > { %v1050_v51 = vmax.f32 %v1046_v23, %v2911_v46 }
 0x2e2   : > { %v1053_v54 = vmax.f32 %v1049_v50, %v1050_v51 }
 0x2e4   : > { %v1055_v55 = vmax.f32 %v1053_v54, %v1054_v53 }
 0x2e6   : > { %v1056_v57 = vrot.slane %v1055_v55, 4 }
 0x2e8   : > { %v1057_v58 = vmax.f32 %v1055_v55, %v1056_v57 }
 0x2ea   : > { %v1058_v60 = vrot.slane %v1057_v58, 2 }
 0x2ec   : > { %v1059_v62 = vmax.f32 %v1057_v58, %v1058_v60 }
 0x2ee   : > { %v1060_v1 = vrot.slane %v1059_v62, 1 }
 0x2f0   : > { %v2955_v6 = vmax.f32 %v1059_v62, %v1060_v1 }
 0x2f2   : > { %v1062_v10 = vsub.f32 %v2849_v24, %v2955_v6  ;;  %v1063_v8 = vsub.f32 %v2853_v25, %v2955_v6  ;;  %v1064_v11 = vsub.f32 %v2855_v2, %v2955_v6  ;;  %v1065_v12 = vsub.f32 %v2859_v26, %v2955_v6 }
 0x2f3   : > { %v1066_v15 = vsub.f32 %v2861_v27, %v2955_v6  ;;  %v1067_v19 = vsub.f32 %v2865_v18, %v2955_v6  ;;  %v1068_v24 = vsub.f32 %v2867_v28, %v2955_v6  ;;  %v1069_v2 = vsub.f32 %v2870_v29, %v2955_v6 }
 0x2f4   : > { %v1094_v13 = vmul.f32 1.442695, %v1062_v10  ;;  %v1096_v63 = vmul.f32 1.442695, %v1063_v8  ;;  %v1098_v16 = vmul.f32 1.442695, %v1064_v11  ;;  %v1070_v26 = vsub.f32 %v2872_v30, %v2955_v6 }
 0x2f5   : > { %v1100_v25 = vmul.f32 1.442695, %v1065_v12  ;;  %v1102_v20 = vmul.f32 1.442695, %v1066_v15  ;;  %v1071_v27 = vsub.f32 %v2875_v31, %v2955_v6  ;;  %v1104_v21 = vmul.f32 1.442695, %v1067_v19 }
 0x2f6   : > { %2323 = vpow2.f32 %v1094_v13  ;;  %v1076_v18 = vsub.f32 %v2895_v39, %v2955_v6  ;;  %v1106_v28 = vmul.f32 1.442695, %v1068_v24  ;;  %v1077_v29 = vsub.f32 %v2899_v41, %v2955_v6 }
 0x2f7   : > { %2325 = vpow2.f32 %v1096_v63  ;;  %v1108_v49 = vmul.f32 1.442695, %v1069_v2  ;;  %v1074_v30 = vsub.f32 %v2886_v3, %v2955_v6  ;;  %v1110_v50 = vmul.f32 1.442695, %v1070_v26 }
 0x2f8   : > { %2327 = vpow2.f32 %v1098_v16  ;;  %v1075_v31 = vsub.f32 %v2891_v37, %v2955_v6  ;;  %v1112_v51 = vmul.f32 1.442695, %v1071_v27  ;;  %v1080_v54 = vsub.f32 %v2909_v4, %v2955_v6 }
 0x2f9   : > { %2329 = vpow2.f32 %v1100_v25  ;;  %v1122_v41 = vmul.f32 1.442695, %v1076_v18  ;;  %v1081_v3 = vsub.f32 %v2913_v47, %v2955_v6  ;;  %v1124_v55 = vmul.f32 1.442695, %v1077_v29 }
 0x2fa   : > { %2331 = vpow2.f32 %v1102_v20  ;;  %v1072_v58 = vsub.f32 %v2879_v33, %v2955_v6  ;;  %v1118_v60 = vmul.f32 1.442695, %v1074_v30  ;;  %v1073_v62 = vsub.f32 %v2882_v34, %v2955_v6 }
 0x2fb   : > { %2333 = vpow2.f32 %v1104_v21  ;;  %v1120_v4 = vmul.f32 1.442695, %v1075_v31  ;;  %v1130_v47 = vmul.f32 1.442695, %v1080_v54  ;;  %v1132_v11 = vmul.f32 1.442695, %v1081_v3 }
 0x2fc   : > { %v2977_v22 = vpop.eup %2323  ;;  %2335 = vpow2.f32 %v1106_v28  ;;  %v1114_v13 = vmul.f32 1.442695, %v1072_v58  ;;  %v1116_v34 = vmul.f32 1.442695, %v1073_v62  ;;  %v1078_v26 = vsub.f32 %v2901_v42, %v2955_v6 }
 0x2fd   : > { %v2981_v23 = vpop.eup %2325  ;;  %2337 = vpow2.f32 %v1108_v49  ;;  %v1092_v21 = vsub.f32 %v2924_v56, %v2955_v6  ;;  %v1093_v49 = vsub.f32 %v2943_v17, %v2955_v6  ;;  %v1091_v31 = vsub.f32 %v2911_v46, %v2955_v6 }
 0x2fe   : > { %v1158_v39 = vadd.f32 %v2981_v23, %v2977_v22  ;;  %v2991_v53 = vpop.eup %2327  ;;  %2339 = vpow2.f32 %v1110_v50  ;;  %v1090_v50 = vsub.f32 %v2907_v45, %v2955_v6  ;;  %v1079_v54 = vsub.f32 %v2905_v44, %v2955_v6 }
 0x2ff   : > { %v2998_v37 = vpop.eup %2329  ;;  %2341 = vpow2.f32 %v1112_v51  ;;  %v1126_v51 = vmul.f32 1.442695, %v1078_v26  ;;  %v1156_v45 = vmul.f32 1.442695, %v1093_v49  ;;  %v1088_v58 = vsub.f32 %v2897_v40, %v2955_v6 }
 0x300   : > { %v1159_v57 = vadd.f32 %v2991_v53, %v1158_v39  ;;  %v3005_v10 = vpop.eup %2331  ;;  %2343 = vpow2.f32 %v1122_v41  ;;  %v1154_v41 = vmul.f32 1.442695, %v1092_v21  ;;  %v1089_v46 = vsub.f32 %v2903_v43, %v2955_v6 }
 0x301   : > { %v3007_v8 = vpop.eup %2333  ;;  %2345 = vpow2.f32 %v1124_v55  ;;  %v1152_v62 = vmul.f32 1.442695, %v1091_v31  ;;  %v1128_v44 = vmul.f32 1.442695, %v1079_v54  ;;  %v1146_v40 = vmul.f32 1.442695, %v1088_v58 }
 0x302   : > { %v1160_v1 = vadd.f32 %v2998_v37, %v1159_v57  ;;  %v3010_v33 = vpop.eup %2335  ;;  %2347 = vpow2.f32 %v1118_v60  ;;  %v1150_v60 = vmul.f32 1.442695, %v1090_v50  ;;  %v1087_v43 = vsub.f32 %v2893_v38, %v2955_v6 }
 0x303   : > { %v3012_v63 = vpop.eup %2337  ;;  %2349 = vpow2.f32 %v1120_v4 }
 0x304   : > { %v1161_v12 = vadd.f32 %v3005_v10, %v1160_v1  ;;  %v3015_v16 = vpop.eup %2339  ;;  %2351 = vpow2.f32 %v1130_v47  ;;  %v1082_v47 = vsub.f32 %v2929_v61, %v2955_v6 }
 0x305   : > { %v2342_v19 = vpop.eup %2341  ;;  %2353 = vpow2.f32 %v1132_v11 }
 0x306   : > { %v1162_v15 = vadd.f32 %v3007_v8, %v1161_v12  ;;  %v2344_v25 = vpop.eup %2343  ;;  %2355 = vpow2.f32 %v1114_v13  ;;  %v1086_v12 = vsub.f32 %v2888_v36, %v2955_v6  ;;  %v1148_v13 = vmul.f32 1.442695, %v1089_v46 }
 0x307   : > { %v2346_v2 = vpop.eup %2345  ;;  %2357 = vpow2.f32 %v1116_v34  ;;  %v1199_v61 = vpack.c.bf16 %v2342_v19, %v3015_v16  ;;  %v1134_v26 = vmul.f32 1.442695, %v1082_v47 }
 0x308   : > { %v1163_v24 = vadd.f32 %v3010_v33, %v1162_v15  ;;  %v2348_v27 = vpop.eup %2347  ;;  %v1202_v18 = vpack.c.bf16 %v2346_v2, %v2344_v25  ;;  %2359 = vpow2.f32 %v1126_v51  ;;  %v1083_v15 = vsub.f32 %v2945_v14, %v2955_v6 }
 0x309   : > { %v2350_v28 = vpop.eup %2349  ;;  %2361 = vpow2.f32 %v1154_v41  ;;  %v1142_v21 = vmul.f32 1.442695, %v1086_v12  ;;  %v1085_v14 = vsub.f32 %v2884_v35, %v2955_v6 }
 0x30a   : > { %v1164_v20 = vadd.f32 %v3012_v63, %v1163_v24  ;;  %v3026_v30 = vpop.eup %2351  ;;  %1231 = vmatpush.bf16.msrb.mxu1 %v1202_v18  ;;  %v1201_v3 = vpack.c.bf16 %v2350_v28, %v2348_v27  ;;  %2363 = vpow2.f32 %v1156_v45  ;;  %v1144_v18 = vmul.f32 1.442695, %v1087_v43 }
 0x30b   : > { %v3030_v42 = vpop.eup %2353  ;;  %2365 = vpow2.f32 %v1150_v60  ;;  %v1140_v35 = vmul.f32 1.442695, %v1085_v14 }
 0x30c   : > { %v1165_v29 = vadd.f32 %v3015_v16, %v1164_v20  ;;  %v2356_v39 = vpop.eup %2355  ;;  %v1204_v17 = vpack.c.bf16 %v3030_v42, %v3026_v30  ;;  %2367 = vpow2.f32 %v1152_v62 }
 0x30d   : > { %v2358_v55 = vpop.eup %2357  ;;  %2369 = vpow2.f32 %v1128_v44 }
 0x30e   : > { %v1166_v56 = vadd.f32 %v2342_v19, %v1165_v29  ;;  %1232 = vmatpush.bf16.msrb.mxu1 %v1201_v3  ;;  %v1200_v1 = vpack.c.bf16 %v2358_v55, %v2356_v39  ;;  %v3051_v24 = vpop.eup %2359  ;;  %2371 = vpow2.f32 %v1146_v40  ;;  %v1198_v29 = vpack.c.bf16 %v3012_v63, %v3010_v33 }
 0x30f   : > { %v3053_v36 = vpop.eup %2361  ;;  %2373 = vpow2.f32 %v1148_v13 }
 0x310   : > { %v1167_v57 = vadd.f32 %v2356_v39, %v1166_v56  ;;  %v3057_v38 = vpop.eup %2363  ;;  %2375 = vpow2.f32 %v1134_v26  ;;  %v1197_v56 = vpack.c.bf16 %v3007_v8, %v3005_v10  ;;  %v2141_v10 = vld [vmem:[#allocation3 + $0x20] sm:$0xf]  ;;  %v2245_v8 = vld [vmem:[#allocation3 + $0x24] sm:$0xf0] }
 0x311   : > { %v2366_v19 = vpop.eup %2365  ;;  %2377 = vpow2.f32 %v1142_v21  ;;  %v2142_v47 = vor.u32 %v2245_v8, %v2141_v10 }
 0x312   : > { %v1168_v4 = vadd.f32 %v2358_v55, %v1167_v57  ;;  %1233 = vmatpush.bf16.msrb.mxu1 %v1200_v1  ;;  %2379 = vpow2.f32 %v1144_v18  ;;  %v1196_v55 = vpack.c.bf16 %v2998_v37, %v2991_v53 }
 0x314   : > { %v1169_v11 = vadd.f32 %v2348_v27, %v1168_v4  ;;  %v1084_v27 = vsub.f32 %v2877_v32, %v2955_v6  ;;  %v2368_v32 = vpop.eup %2367  ;;  %v1195_v4 = vpack.c.bf16 %v2981_v23, %v2977_v22  ;;  %v2143_v22 = vld [vmem:[#allocation3 + $0x28] sm:$0xf0]  ;;  %v2149_v23 = vld [vmem:[#allocation3 + $0x30] sm:$0xf] }
 0x315   : > { %v2370_v50 = vpop.eup %2369  ;;  %v1209_v51 = vpack.c.bf16 %v2368_v32, %v2366_v19 }
 0x316   : > { %v1170_v34 = vadd.f32 %v2350_v28, %v1169_v11  ;;  %1234 = vmatpush.bf16.msrb.mxu1 %v1199_v61  ;;  %v1136_v28 = vmul.f32 1.442695, %v1083_v15  ;;  %v1138_v31 = vmul.f32 1.442695, %v1084_v27  ;;  %v2244_v15 = vld [vmem:[#allocation3 + $0x24] sm:$0xf] }
 0x317   : > { %v2247_v61 = vld [vmem:[#allocation3 + $0x34] sm:$0xf0]  ;;  %v2146_v21 = vor.u32 %v2244_v15, %v2143_v22 }
 0x318   : > { %v1171_v20 = vadd.f32 %v2344_v25, %v1170_v34  ;;  %v1210_v25 = vpack.c.bf16 %v3057_v38, %v3053_v36  ;;  %2381 = vpow2.f32 %v1136_v28  ;;  %v2150_v14 = vor.u32 %v2247_v61, %v2149_v23 }
 0x319   : > { %2383 = vpow2.f32 %v1138_v31 }
 0x31a   : > { %v1172_v16 = vadd.f32 %v2346_v2, %v1171_v20  ;;  %1250 = vmatpush.bf16.msra.mxu2 %v1210_v25  ;;  %1235 = vmatpush.bf16.msrb.mxu1 %v1198_v29  ;;  %v2372_v2 = vpop.eup %2371  ;;  %2385 = vpow2.f32 %v1140_v35  ;;  %v1203_v20 = vpack.c.bf16 %v2370_v50, %v3051_v24 }
 0x31b   : > { %v2374_v39 = vpop.eup %2373 }
 0x31c   : > { %v1173_v49 = vadd.f32 %v3051_v24, %v1172_v16  ;;  %v2376_v63 = vpop.eup %2375  ;;  %v1208_v3 = vpack.c.bf16 %v2374_v39, %v2372_v2  ;;  %v3082_v16 = vpop.f32.mrf.mxu3 }
 0x31d   : > { %v2378_v41 = vpop.eup %2377 }
 0x31e   : > { %v1174_v6 = vadd.f32 %v2370_v50, %v1173_v49  ;;  %1251 = vmatpush.bf16.msra.mxu2 %v1209_v51  ;;  %1236 = vmatpush.bf16.msrb.mxu1 %v1197_v56  ;;  %v2380_v57 = vpop.eup %2379 }
 0x31f   : > { %v2382_v58 = vpop.eup %2381  ;;  %v1207_v62 = vpack.c.bf16 %v2380_v57, %v2378_v41 }
 0x320   : > { %v1175_v33 = vadd.f32 %v3026_v30, %v1174_v6  ;;  %v2384_v46 = vpop.eup %2383  ;;  %v1205_v40 = vpack.c.bf16 %v2382_v58, %v2376_v63  ;;  %v2246_v30 = vld [vmem:[#allocation3 + $0x34] sm:$0xf] }
 0x321   : > { %v2386_v44 = vpop.eup %2385 }
 0x322   : > { %v1176_v54 = vadd.f32 %v3030_v42, %v1175_v33  ;;  %1252 = vmatpush.bf16.msra.mxu2 %v1208_v3  ;;  %1237 = vmatpush.bf16.msrb.mxu1 %v1196_v55  ;;  %v1206_v53 = vpack.c.bf16 %v2386_v44, %v2384_v46  ;;  %v2151_v42 = vld [vmem:[#allocation3 + $0x38] sm:$0xf0] }
 0x324   : > { %v1177_v45 = vadd.f32 %v2376_v63, %v1176_v54  ;;  %v3086_v24 = vpop.f32.mrf.mxu3 }
 0x326   : > { %v1178_v60 = vadd.f32 %v2382_v58, %v1177_v45  ;;  %1253 = vmatpush.bf16.msra.mxu2 %v1207_v62  ;;  %1238 = vmatpush.bf16.msrb.mxu1 %v1195_v4 }
 0x328   : > { %v1179_v1 = vadd.f32 %v2384_v46, %v1178_v60 }
 0x329   : > { %1239 = vmatmul.bf16.vlgmr.msrb.gmra.mxu1 %v2142_v47 }
 0x32a   : > { %v1180_v11 = vadd.f32 %v2386_v44, %v1179_v1  ;;  %1254 = vmatpush.bf16.msra.mxu2 %v1206_v53  ;;  %v1501_v1 = vmax.f32 %v3086_v24, %v3082_v16 }
 0x32c   : > { %v1181_v37 = vadd.f32 %v2378_v41, %v1180_v11 }
 0x32e   : > { %v1182_v12 = vadd.f32 %v2380_v57, %v1181_v37  ;;  %1255 = vmatpush.bf16.msra.mxu2 %v1205_v40 }
 0x330   : > { %v1183_v43 = vadd.f32 %v2372_v2, %v1182_v12 }
 0x332   : > { %v1184_v13 = vadd.f32 %v2374_v39, %v1183_v43  ;;  %1256 = vmatpush.bf16.msra.mxu2 %v1204_v17  ;;  %v2154_v17 = vor.u32 %v2246_v30, %v2151_v42 }
 0x334   : > { %v1185_v34 = vadd.f32 %v2366_v19, %v1184_v13 }
 0x336   : > { %v1186_v26 = vadd.f32 %v2368_v32, %v1185_v34  ;;  %1257 = vmatpush.bf16.msra.mxu2 %v1203_v20 }
 0x338   : > { %v1187_v27 = vadd.f32 %v3053_v36, %v1186_v26  ;;  %v3088_v36 = vpop.f32.mrf.mxu3 }
 0x339   : > { %1258 = vmatmul.bf16.vlgmr.msra.gmra.mxu2 %v2146_v21  ;;  %1244 = vmatmul.bf16.gmra.mxu1 %v2150_v14  ;;  %v1505_v53 = vmax.f32 %v1501_v1, %v3088_v36 }
 0x33a   : > { %1412 = vmatpush.bf16.msrb.mxu2 %v2829_v0  ;;  %v1188_v18 = vadd.f32 %v3057_v38, %v1187_v27  ;;  %v1345_v0 = vpop.trf.xlu1 }
 0x33b   : > { %2195 = vmatmul.msk.bf16.gmra.mxu3 %vm887_vm1, %v1345_v0 }
 0x33e   : > { %1413 = vmatpush.bf16.msrb.mxu2 %v2833_v7 }
 0x340   : > { %v3093_v7 = vpop.f32.mrf.mxu3 }
 0x341   : > { %v1502_v43 = vmax.f32 %v3093_v7, %v1505_v53 }
 0x348   : > { %v3097_v38 = vpop.f32.mrf.mxu3 }
 0x349   : > { %1263 = vmatmul.bf16.gmra.mxu2 %v2154_v17  ;;  %v1506_v34 = vmax.f32 %v1502_v43, %v3097_v38 }
 0x350   : > { %v3099_v19 = vpop.f32.mrf.mxu3 }
 0x351   : > { %v1509_v22 = vmax.f32 %v3099_v19, %v1506_v34 }
 0x358   : > { %v3103_v25 = vpop.f32.mrf.mxu3 }
 0x359   : > { %2180 = vmatmul.msk.bf16.vlgmr.msrb.gmra.mxu2 %vm887_vm1, %v2816_v48  ;;  %v1189_v48 = vrot.slane %v1188_v18, 4  ;;  %v1513_v61 = vmax.f32 %v1509_v22, %v3103_v25 }
 0x35b   : > { %v1190_v28 = vadd.f32 %v1189_v48, %v1188_v18 }
 0x360   : > { %v3107_v32 = vpop.f32.mrf.mxu3 }
 0x361   : > { %v1517_v20 = vmax.f32 %v1513_v61, %v3107_v32 }
 0x368   : > { %v3109_v50 = vpop.f32.mrf.mxu3 }
 0x369   : > { %2181 = vmatmul.msk.bf16.gmra.mxu2 %vm887_vm1, %v2819_v52  ;;  %v1191_v52 = vrot.slane %v1190_v28, 2  ;;  %v1521_v21 = vmax.f32 %v1517_v20, %v3109_v50 }
 0x36b   : > { %v1192_v29 = vadd.f32 %v1191_v52, %v1190_v28 }
 0x36d   : > { %v1193_v49 = vrot.slane %v1192_v29, 1 }
 0x370   : > { %v3111_v6 = vpop.f32.mrf.mxu3 }
 0x371   : > { %v1503_v18 = vmax.f32 %v3111_v6, %v1521_v21 }
 0x378   : > { %v3113_v39 = vpop.f32.mrf.mxu3 }
 0x379   : > { %2182 = vmatmul.msk.bf16.gmra.mxu2 %vm887_vm1, %v2822_v5  ;;  %v1194_v5 = vadd.f32 %v1193_v49, %v1192_v29  ;;  %v1507_v30 = vmax.f32 %v1503_v18, %v3113_v39 }
 0x37b   : > { %2387 = vrcp.f32 %v1194_v5  ;;  %vm1274_vm3 = vweird.f32 %v1194_v5  ;;  %v1278_v33 = vand.u32 2147483647, %v1194_v5 }
 0x37d   : > { %vm1279_vm5 = vcmp.eq.f32.partialorder %v1278_v33, 8.507059e+37 }
 0x380   : > { %v3119_v58 = vpop.f32.mrf.mxu3 }
 0x381   : > { %v2388_v31 = vpop.eup %2387  ;;  %v1511_v0 = vmax.f32 %v1507_v30, %v3119_v58 }
 0x382   : > { %v1270_v35 = vmul.f32 %v2388_v31, %v1194_v5  ;;  %vm1275_vm2 = vweird.f32 %v2388_v31 }
 0x383   : > { %vm1276_vm4 = vmor %vm1274_vm3, %vm1275_vm2 }
 0x388   : > { %v3125_v62 = vpop.f32.mrf.mxu3 }
 0x389   : > { %2183 = vmatmul.msk.bf16.gmra.mxu2 %vm887_vm1, %v2825_v59  ;;  %v1271_v59 = vsub.f32 1.0, %v1270_v35  ;;  %v1515_v48 = vmax.f32 %v1511_v0, %v3125_v62 }
 0x38b   : > { %v1272_v2 = vmul.f32 %v2388_v31, %v1271_v59 }
 0x38d   : > { %v1273_v56 = vadd.f32 %v2388_v31, %v1272_v2 }
 0x38f   : > { %v1277_v63 = vsel %vm1276_vm4, %v2388_v31, %v1273_v56 }
 0x390   : > { %v3134_v40 = vpop.f32.mrf.mxu3 }
 0x391   : > { %v1519_v29 = vmax.f32 %v1515_v48, %v3134_v40 }
 0x398   : > { %v3143_v23 = vpop.f32.mrf.mxu3 }
 0x399   : > { %2184 = vmatmul.msk.bf16.gmra.mxu2 %vm887_vm1, %v2837_v9  ;;  %v1280_v9 = vand.u32 2147483648, %v1194_v5  ;;  %v1510_v49 = vmax.f32 %v3143_v23, %v1519_v29 }
 0x39b   : > { %v1281_v41 = vor.u32 1.1754944e-38, %v1280_v9 }
 0x39d   : > { %v1282_v55 = vsel %vm1279_vm5, %v1281_v41, %v1277_v63 }
 0x3a0   : > { %v3147_v27 = vpop.f32.mrf.mxu3 }
 0x3a1   : > { %v1514_v31 = vmax.f32 %v1510_v49, %v3147_v27 }
 0x3a6   : > { %v1240_v51 = vpop.f32.mrf.mxu1 }
 0x3a8   : > { %v3152_v42 = vpop.f32.mrf.mxu3 }
 0x3a9   : > { %v1518_v59 = vmax.f32 %v1514_v31, %v3152_v42 }
 0x3ae   : > { %v1242_v57 = vpop.f32.mrf.mxu1 }
 0x3b0   : > { %v3156_v52 = vpop.f32.mrf.mxu3 }
 0x3b6   : > { %v1245_v46 = vpop.f32.mrf.mxu1 }
 0x3b8   : > { %v3161_v35 = vpop.f32.mrf.mxu3 }
 0x3bc   : > { %v1259_v54 = vpop.f32.mrf.mxu2 }
 0x3bd   : > { %v1260_v3 = vadd.f32 %v1259_v54, %v1240_v51  ;;  %v1522_v51 = vmax.f32 %v1518_v59, %v3156_v52 }
 0x3be   : > { %v1247_v11 = vpop.f32.mrf.mxu1 }
 0x3bf   : > { %v3115_v45 = vmul.f32 %v1282_v55, %v1260_v3  ;;  %v1524_v9 = vmax.f32 %v3161_v35, %v1522_v51 }
 0x3c0   : > { %v3165_v56 = vpop.f32.mrf.mxu3 }
 0x3c1   : > { %1758 = vst [vmem:[%s2626_s9] sm:$0xff] %v3115_v45  ;;  %v1504_v54 = vmax.f32 %v3165_v56, %v1524_v9 }
 0x3c4   : > { %v1261_v10 = vpop.f32.mrf.mxu2 }
 0x3c5   : > { %v1262_v8 = vadd.f32 %v1261_v10, %v1242_v57 }
 0x3c7   : > { %v3121_v60 = vmul.f32 %v1282_v55, %v1262_v8 }
 0x3c9   : > { %1759 = vst [vmem:[%s2626_s9 + $0x8] sm:$0xff] %v3121_v60 }
 0x3cc   : > { %v1264_v4 = vpop.f32.mrf.mxu2 }
 0x3cd   : > { %v1265_v44 = vadd.f32 %v1264_v4, %v1245_v46 }
 0x3cf   : > { %v3129_v47 = vmul.f32 %v1282_v55, %v1265_v44 }
 0x3d1   : > { %1760 = vst [vmem:[%s2626_s9 + $0x10] sm:$0xff] %v3129_v47 }
 0x3d4   : > { %v1266_v37 = vpop.f32.mrf.mxu2 }
 0x3d5   : > { %v1267_v12 = vadd.f32 %v1266_v37, %v1247_v11 }
 0x3d7   : > { %v3137_v13 = vmul.f32 %v1282_v55, %v1267_v12  ;;  %v3169_v55 = vpop.f32.mrf.mxu3 }
 0x3d9   : > { %1761 = vst [vmem:[%s2626_s9 + $0x18] sm:$0xff] %v3137_v13 }
 0x3dc   : > { %v1415_v15 = vpop.f32.mrf.mxu2 }
 0x3df   : > { %v3172_v11 = vpop.f32.mrf.mxu3 }
 0x3e4   : > { %v1417_v26 = vpop.f32.mrf.mxu2 }
 0x3ec   : > { %v1420_v14 = vpop.f32.mrf.mxu2 }
 0x3f4   : > { %v1422_v17 = vpop.f32.mrf.mxu2 }
 0x3fc   : > { %v1425_v28 = vpop.f32.mrf.mxu2 }
 0x3fd   : > { %v1495_v57 = vmax.f32 %v1415_v15, %v1425_v28 }
 0x404   : > { %v1427_v5 = vpop.f32.mrf.mxu2 }
 0x405   : > { %v1496_v1 = vmax.f32 %v1417_v26, %v1427_v5 }
 0x40c   : > { %v1430_v2 = vpop.f32.mrf.mxu2 }
 0x40d   : > { %v1497_v63 = vmax.f32 %v1420_v14, %v1430_v2 }
 0x40f   : > { %v1508_v3 = vmax.f32 %v1504_v54, %v1497_v63 }
 0x414   : > { %v1432_v33 = vpop.f32.mrf.mxu2 }
 0x415   : > { %v1498_v41 = vmax.f32 %v1422_v17, %v1432_v33 }
 0x417   : > { %v1512_v10 = vmax.f32 %v1508_v3, %v1498_v41 }
 0x419   : > { %v1516_v4 = vmax.f32 %v1512_v10, %v3169_v55 }
 0x41c   : > { %v1435_v8 = vpop.f32.mrf.mxu2 }
 0x41d   : > { %v1499_v46 = vmax.f32 %v1495_v57, %v1435_v8 }
 0x41f   : > { %v1520_v44 = vmax.f32 %v1516_v4, %v1499_v46 }
 0x421   : > { %v1523_v37 = vmax.f32 %v3172_v11, %v1520_v44 }
 0x424   : > { %v1437_v53 = vpop.f32.mrf.mxu2 }
 0x425   : > { %v1500_v12 = vmax.f32 %v1496_v1, %v1437_v53 }
 0x427   : > { %v1525_v43 = vmax.f32 %v1523_v37, %v1500_v12 }
 0x429   : > { %v1526_v34 = vrot.slane %v1525_v43, 4 }
 0x42b   : > { %v1527_v22 = vmax.f32 %v1525_v43, %v1526_v34 }
 0x42d   : > { %v1528_v61 = vrot.slane %v1527_v22, 2 }
 0x42f   : > { %v1529_v20 = vmax.f32 %v1527_v22, %v1528_v61 }
 0x431   : > { %v1530_v21 = vrot.slane %v1529_v20, 1 }
 0x433   : > { %v3175_v18 = vmax.f32 %v1529_v20, %v1530_v21 }
 0x435   : > { %v1532_v30 = vsub.f32 %v1415_v15, %v3175_v18  ;;  %v1533_v0 = vsub.f32 %v1417_v26, %v3175_v18  ;;  %v1534_v48 = vsub.f32 %v1420_v14, %v3175_v18  ;;  %v1535_v29 = vsub.f32 %v1422_v17, %v3175_v18 }
 0x436   : > { %v1536_v49 = vsub.f32 %v1425_v28, %v3175_v18  ;;  %v1537_v31 = vsub.f32 %v1427_v5, %v3175_v18  ;;  %v1538_v15 = vsub.f32 %v1430_v2, %v3175_v18  ;;  %v1539_v26 = vsub.f32 %v1432_v33, %v3175_v18 }
 0x437   : > { %v1564_v59 = vmul.f32 1.442695, %v1532_v30  ;;  %v1566_v51 = vmul.f32 1.442695, %v1533_v0  ;;  %v1568_v9 = vmul.f32 1.442695, %v1534_v48  ;;  %v1540_v14 = vsub.f32 %v1435_v8, %v3175_v18 }
 0x438   : > { %v1570_v63 = vmul.f32 1.442695, %v1535_v29  ;;  %v1572_v54 = vmul.f32 1.442695, %v1536_v49  ;;  %v1574_v41 = vmul.f32 1.442695, %v1537_v31  ;;  %v1541_v17 = vsub.f32 %v1437_v53, %v3175_v18 }
 0x439   : > { %2389 = vpow2.f32 %v1564_v59  ;;  %v1546_v5 = vsub.f32 %v3097_v38, %v3175_v18  ;;  %v1576_v3 = vmul.f32 1.442695, %v1538_v15  ;;  %v1547_v2 = vsub.f32 %v3099_v19, %v3175_v18 }
 0x43a   : > { %2391 = vpow2.f32 %v1566_v51  ;;  %v1578_v10 = vmul.f32 1.442695, %v1539_v26  ;;  %v1544_v8 = vsub.f32 %v3088_v36, %v3175_v18  ;;  %v1580_v46 = vmul.f32 1.442695, %v1540_v14 }
 0x43b   : > { %2393 = vpow2.f32 %v1568_v9  ;;  %v1545_v38 = vsub.f32 %v3093_v7, %v3175_v18  ;;  %v1582_v1 = vmul.f32 1.442695, %v1541_v17  ;;  %v1592_v19 = vmul.f32 1.442695, %v1546_v5 }
 0x43c   : > { %2395 = vpow2.f32 %v1570_v63  ;;  %v1542_v36 = vsub.f32 %v3082_v16, %v3175_v18  ;;  %v1594_v43 = vmul.f32 1.442695, %v1547_v2  ;;  %v1588_v34 = vmul.f32 1.442695, %v1544_v8 }
 0x43d   : > { %2397 = vpow2.f32 %v1572_v54  ;;  %v1543_v61 = vsub.f32 %v3086_v24, %v3175_v18  ;;  %v1590_v20 = vmul.f32 1.442695, %v1545_v38  ;;  %v1548_v51 = vsub.f32 %v3103_v25, %v3175_v18 }
 0x43e   : > { %2399 = vpow2.f32 %v1574_v41  ;;  %v1584_v30 = vmul.f32 1.442695, %v1542_v36  ;;  %v1549_v54 = vsub.f32 %v3107_v32, %v3175_v18  ;;  %v1562_v26 = vsub.f32 %v3169_v55, %v3175_v18 }
 0x43f   : > { %v3187_v28 = vpop.eup %2389  ;;  %2401 = vpow2.f32 %v1576_v3  ;;  %v1586_v29 = vmul.f32 1.442695, %v1543_v61  ;;  %v1563_v5 = vsub.f32 %v3172_v11, %v3175_v18  ;;  %v1596_v3 = vmul.f32 1.442695, %v1548_v51 }
 0x440   : > { %v3191_v57 = vpop.eup %2391  ;;  %2403 = vpow2.f32 %v1578_v10  ;;  %v1560_v2 = vsub.f32 %v3161_v35, %v3175_v18  ;;  %v1598_v10 = vmul.f32 1.442695, %v1549_v54  ;;  %v1561_v8 = vsub.f32 %v3165_v56, %v3175_v18 }
 0x441   : > { %v3195_v33 = vpop.eup %2393  ;;  %v1628_v4 = vadd.f32 %v3191_v57, %v3187_v28  ;;  %2405 = vpow2.f32 %v1580_v46  ;;  %v1550_v55 = vsub.f32 %v3109_v50, %v3175_v18  ;;  %v1551_v11 = vsub.f32 %v3111_v6, %v3175_v18 }
 0x442   : > { %v3201_v44 = vpop.eup %2395  ;;  %2407 = vpow2.f32 %v1582_v1  ;;  %v1558_v35 = vsub.f32 %v3152_v42, %v3175_v18  ;;  %v1620_v36 = vmul.f32 1.442695, %v1560_v2  ;;  %v1552_v56 = vsub.f32 %v3113_v39, %v3175_v18 }
 0x443   : > { %v3205_v53 = vpop.eup %2397  ;;  %v1629_v37 = vadd.f32 %v3195_v33, %v1628_v4  ;;  %2409 = vpow2.f32 %v1592_v19  ;;  %v1624_v4 = vmul.f32 1.442695, %v1562_v26  ;;  %v1626_v19 = vmul.f32 1.442695, %v1563_v5 }
 0x444   : > { %v3208_v12 = vpop.eup %2399  ;;  %2411 = vpow2.f32 %v1594_v43  ;;  %v1559_v50 = vsub.f32 %v3156_v52, %v3175_v18  ;;  %v1622_v43 = vmul.f32 1.442695, %v1561_v8  ;;  %v1553_v61 = vsub.f32 %v3119_v58, %v3175_v18 }
 0x445   : > { %v1630_v22 = vadd.f32 %v3201_v44, %v1629_v37  ;;  %v1667_v7 = vpack.c.bf16 %v3208_v12, %v3205_v53  ;;  %v3218_v16 = vpop.eup %2401  ;;  %2413 = vpow2.f32 %v1588_v34  ;;  %v1600_v34 = vmul.f32 1.442695, %v1550_v55 }
 0x446   : > { %v3221_v48 = vpop.eup %2403  ;;  %2415 = vpow2.f32 %v1590_v20  ;;  %v1602_v20 = vmul.f32 1.442695, %v1551_v11  ;;  %v1556_v42 = vsub.f32 %v3143_v23, %v3175_v18  ;;  %v1557_v39 = vsub.f32 %v3147_v27, %v3175_v18 }
 0x447   : > { %v1631_v21 = vadd.f32 %v3205_v53, %v1630_v22  ;;  %v3223_v49 = vpop.eup %2405  ;;  %2417 = vpow2.f32 %v1584_v30  ;;  %v1616_v30 = vmul.f32 1.442695, %v1558_v35  ;;  %v1618_v52 = vmul.f32 1.442695, %v1559_v50 }
 0x448   : > { %v3226_v31 = vpop.eup %2407  ;;  %2419 = vpow2.f32 %v1586_v29  ;;  %v1604_v29 = vmul.f32 1.442695, %v1552_v56  ;;  %v1554_v23 = vsub.f32 %v3125_v62, %v3175_v18  ;;  %v1612_v27 = vmul.f32 1.442695, %v1556_v42  ;;  %v2254_v42 = vld [vmem:[#allocation2 + $0x24] sm:$0xf] }
 0x449   : > { %v1632_v0 = vadd.f32 %v3208_v12, %v1631_v21  ;;  %v2410_v59 = vpop.eup %2409  ;;  %2421 = vpow2.f32 %v1596_v3  ;;  %v1669_v58 = vpack.c.bf16 %v3226_v31, %v3223_v49  ;;  %v1614_v26 = vmul.f32 1.442695, %v1557_v39 }
 0x44a   : > { %v2412_v63 = vpop.eup %2411  ;;  %2423 = vpow2.f32 %v1598_v10  ;;  %v1665_v53 = vpack.c.bf16 %v3191_v57, %v3187_v28  ;;  %v2206_v28 = vld [vmem:[#allocation2 + $0x30] sm:$0xf]  ;;  %v2257_v57 = vld [vmem:[#allocation2 + $0x34] sm:$0xf0] }
 0x44b   : > { %v1633_v24 = vadd.f32 %v3218_v16, %v1632_v0  ;;  %v2414_v41 = vpop.eup %2413  ;;  %v1672_v14 = vpack.c.bf16 %v2412_v63, %v2410_v59  ;;  %2425 = vpow2.f32 %v1624_v4 }
 0x44c   : > { %v2416_v17 = vpop.eup %2415  ;;  %2427 = vpow2.f32 %v1626_v19  ;;  %v2198_v19 = vld [vmem:[#allocation2 + $0x20] sm:$0xf] }
 0x44d   : > { %v1634_v9 = vadd.f32 %v3221_v48, %v1633_v24  ;;  %1701 = vmatpush.bf16.msra.mxu1 %v1672_v14  ;;  %v2418_v32 = vpop.eup %2417  ;;  %v1671_v38 = vpack.c.bf16 %v2416_v17, %v2414_v41  ;;  %2429 = vpow2.f32 %v1620_v36  ;;  %v1668_v14 = vpack.c.bf16 %v3221_v48, %v3218_v16 }
 0x44e   : > { %v2420_v1 = vpop.eup %2419  ;;  %2431 = vpow2.f32 %v1622_v43 }
 0x44f   : > { %v1635_v15 = vadd.f32 %v3223_v49, %v1634_v9  ;;  %v1670_v6 = vpack.c.bf16 %v2420_v1, %v2418_v32  ;;  %v3259_v0 = vpop.eup %2421  ;;  %2433 = vpow2.f32 %v1600_v34  ;;  %v1606_v9 = vmul.f32 1.442695, %v1553_v61 }
 0x450   : > { %v3263_v51 = vpop.eup %2423  ;;  %2435 = vpow2.f32 %v1602_v20 }
 0x451   : > { %v1636_v25 = vadd.f32 %v3226_v31, %v1635_v15  ;;  %1702 = vmatpush.bf16.msra.mxu1 %v1671_v38  ;;  %v3267_v54 = vpop.eup %2425  ;;  %2437 = vpow2.f32 %v1616_v30  ;;  %v1666_v38 = vpack.c.bf16 %v3201_v44, %v3195_v33  ;;  %v1673_v39 = vpack.c.bf16 %v3263_v51, %v3259_v0 }
 0x452   : > { %v3269_v15 = vpop.eup %2427  ;;  %2439 = vpow2.f32 %v1618_v52 }
 0x453   : > { %v1637_v46 = vadd.f32 %v2418_v32, %v1636_v25  ;;  %v2430_v49 = vpop.eup %2429  ;;  %2441 = vpow2.f32 %v1604_v29  ;;  %v1680_v62 = vpack.c.bf16 %v3269_v15, %v3267_v54 }
 0x454   : > { %2443 = vpow2.f32 %v1606_v9  ;;  %v2208_v9 = vld [vmem:[#allocation2 + $0x38] sm:$0xf0] }
 0x455   : > { %v1638_v37 = vadd.f32 %v2420_v1, %v1637_v46  ;;  %1703 = vmatpush.bf16.msra.mxu1 %v1670_v6  ;;  %2445 = vpow2.f32 %v1612_v27  ;;  %1720 = vmatpush.bf16.msra.mxu2 %v1680_v62 }
 0x456   : > { %2447 = vpow2.f32 %v1614_v26 }
 0x457   : > { %v1639_v22 = vadd.f32 %v2414_v41, %v1638_v37  ;;  %v2255_v37 = vld [vmem:[#allocation2 + $0x24] sm:$0xf0] }
 0x459   : > { %v1640_v21 = vadd.f32 %v2416_v17, %v1639_v22  ;;  %1704 = vmatpush.bf16.msra.mxu1 %v1669_v58  ;;  %v1608_v17 = vmul.f32 1.442695, %v1554_v23  ;;  %v2256_v23 = vld [vmem:[#allocation2 + $0x34] sm:$0xf] }
 0x45a   : > { %v2211_v27 = vor.u32 %v2256_v23, %v2208_v9 }
 0x45b   : > { %v1641_v24 = vadd.f32 %v2410_v59, %v1640_v21  ;;  %v1555_v59 = vsub.f32 %v3134_v40, %v3175_v18  ;;  %2449 = vpow2.f32 %v1608_v17  ;;  %v2200_v21 = vld [vmem:[#allocation2 + $0x28] sm:$0xf0] }
 0x45c   : > { %v2203_v29 = vor.u32 %v2254_v42, %v2200_v21 }
 0x45d   : > { %v1642_v41 = vadd.f32 %v2412_v63, %v1641_v24  ;;  %v2432_v63 = vpop.eup %2431  ;;  %1705 = vmatpush.bf16.msra.mxu1 %v1668_v14  ;;  %v1610_v18 = vmul.f32 1.442695, %v1555_v59  ;;  %v2207_v24 = vor.u32 %v2257_v57, %v2206_v28 }
 0x45e   : > { %v2434_v5 = vpop.eup %2433  ;;  %v1679_v32 = vpack.c.bf16 %v2432_v63, %v2430_v49 }
 0x45f   : > { %v1643_v31 = vadd.f32 %v3259_v0, %v1642_v41  ;;  %v2436_v40 = vpop.eup %2435  ;;  %2451 = vpow2.f32 %v1610_v18 }
 0x460   : > { %v2438_v25 = vpop.eup %2437  ;;  %1721 = vmatpush.bf16.msra.mxu2 %v1679_v32  ;;  %v1674_v61 = vpack.c.bf16 %v2436_v40, %v2434_v5 }
 0x461   : > { %v1644_v3 = vadd.f32 %v3263_v51, %v1643_v31  ;;  %v2440_v10 = vpop.eup %2439  ;;  %1706 = vmatpush.bf16.msra.mxu1 %v1667_v7  ;;  %v2199_v7 = vor.u32 %v2255_v37, %v2198_v19 }
 0x462   : > { %v2442_v8 = vpop.eup %2441  ;;  %v1678_v4 = vpack.c.bf16 %v2440_v10, %v2438_v25 }
 0x463   : > { %v1645_v2 = vadd.f32 %v2434_v5, %v1644_v3  ;;  %v2444_v16 = vpop.eup %2443 }
 0x464   : > { %v2446_v48 = vpop.eup %2445  ;;  %1722 = vmatpush.bf16.msra.mxu2 %v1678_v4  ;;  %v1675_v44 = vpack.c.bf16 %v2444_v16, %v2442_v8 }
 0x465   : > { %v1646_v55 = vadd.f32 %v2436_v40, %v1645_v2  ;;  %v2448_v1 = vpop.eup %2447  ;;  %1707 = vmatpush.bf16.msra.mxu1 %v1666_v38 }
 0x466   : > { %v2450_v35 = vpop.eup %2449  ;;  %v1677_v56 = vpack.c.bf16 %v2448_v1, %v2446_v48 }
 0x467   : > { %v1647_v46 = vadd.f32 %v2442_v8, %v1646_v55  ;;  %v2452_v12 = vpop.eup %2451 }
 0x468   : > { %1723 = vmatpush.bf16.msra.mxu2 %v1677_v56  ;;  %v1676_v34 = vpack.c.bf16 %v2452_v12, %v2450_v35 }
 0x469   : > { %v1648_v11 = vadd.f32 %v2444_v16, %v1647_v46  ;;  %1708 = vmatpush.bf16.msra.mxu1 %v1665_v53 }
 0x46b   : > { %v1649_v36 = vadd.f32 %v2450_v35, %v1648_v11 }
 0x46c   : > { %1709 = vmatmul.bf16.vlgmr.msra.gmra.mxu1 %v2199_v7  ;;  %1724 = vmatpush.bf16.msra.mxu2 %v1676_v34 }
 0x46d   : > { %v1650_v50 = vadd.f32 %v2452_v12, %v1649_v36 }
 0x46f   : > { %v1651_v43 = vadd.f32 %v2446_v48, %v1650_v50 }
 0x470   : > { %1725 = vmatpush.bf16.msra.mxu2 %v1675_v44 }
 0x471   : > { %v1652_v33 = vadd.f32 %v2448_v1, %v1651_v43 }
 0x473   : > { %v1653_v22 = vadd.f32 %v2438_v25, %v1652_v33 }
 0x474   : > { %1726 = vmatpush.bf16.msra.mxu2 %v1674_v61 }
 0x475   : > { %v1654_v6 = vadd.f32 %v2440_v10, %v1653_v22 }
 0x477   : > { %v1655_v20 = vadd.f32 %v2430_v49, %v1654_v6 }
 0x478   : > { %1727 = vmatpush.bf16.msra.mxu2 %v1673_v39 }
 0x479   : > { %v1656_v30 = vadd.f32 %v2432_v63, %v1655_v20 }
 0x47b   : > { %v1657_v52 = vadd.f32 %v3267_v54, %v1656_v30  ;;  %1728 = vmatmul.bf16.vlgmr.msra.gmra.mxu2 %v2203_v29 }
 0x47c   : > { %1714 = vmatmul.bf16.gmra.mxu1 %v2207_v24 }
 0x47d   : > { %v1658_v58 = vadd.f32 %v3269_v15, %v1657_v52 }
 0x47f   : > { %v1659_v41 = vrot.slane %v1658_v58, 4 }
 0x481   : > { %v1660_v59 = vadd.f32 %v1659_v41, %v1658_v58 }
 0x483   : > { %v1661_v26 = vrot.slane %v1660_v59, 2 }
 0x485   : > { %v1662_v49 = vadd.f32 %v1661_v26, %v1660_v59 }
 0x487   : > { %v1663_v31 = vrot.slane %v1662_v49, 1 }
 0x489   : > { %v1664_v62 = vadd.f32 %v1663_v31, %v1662_v49 }
 0x48b   : > { %1733 = vmatmul.bf16.gmra.mxu2 %v2211_v27  ;;  %2453 = vrcp.f32 %v1664_v62  ;;  %v1750_v17 = vand.u32 2147483648, %v1664_v62  ;;  %vm1744_vm7 = vweird.f32 %v1664_v62  ;;  %v1748_v5 = vand.u32 2147483647, %v1664_v62 }
 0x48d   : > { %v1751_v18 = vor.u32 1.1754944e-38, %v1750_v17  ;;  %vm1749_vm9 = vcmp.eq.f32.partialorder %v1748_v5, 8.507059e+37 }
 0x491   : > { %v2454_v0 = vpop.eup %2453 }
 0x492   : > { %v1740_v51 = vmul.f32 %v2454_v0, %v1664_v62  ;;  %vm1745_vm6 = vweird.f32 %v2454_v0 }
 0x493   : > { %vm1746_vm8 = vmor %vm1744_vm7, %vm1745_vm6 }
 0x494   : > { %v1741_v54 = vsub.f32 1.0, %v1740_v51 }
 0x496   : > { %v1742_v14 = vmul.f32 %v2454_v0, %v1741_v54 }
 0x498   : > { %v1743_v15 = vadd.f32 %v2454_v0, %v1742_v14 }
 0x49a   : > { %v1747_v3 = vsel %vm1746_vm8, %v2454_v0, %v1743_v15 }
 0x49b   : > { %v1752_v2 = vsel %vm1749_vm9, %v1751_v18, %v1747_v3 }
 0x4e9   : > { %v1710_v63 = vpop.f32.mrf.mxu1 }
 0x4f1   : > { %v1712_v10 = vpop.f32.mrf.mxu1 }
 0x4f9   : > { %v1715_v4 = vpop.f32.mrf.mxu1 }
 0x4fe   : > { %v1729_v40 = vpop.f32.mrf.mxu2 }
 0x4ff   : > { %v1730_v25 = vadd.f32 %v1729_v40, %v1710_v63 }
 0x501   : > { %v1754_v32 = vmul.f32 %v1752_v2, %v1730_v25  ;;  %v1717_v37 = vpop.f32.mrf.mxu1 }
 0x503   : > { %2212 = vst [vmem:[%s2626_s9 + $0x20] sm:$0xff] %v1754_v32  ;;  %v1767_v8 = vadd.f32 %v1754_v32, %v3115_v45 }
 0x505   : > { %1771 = vst [vmem:[%s2624_s15] sm:$0xff] %v1767_v8 }
 0x506   : > { %v1731_v55 = vpop.f32.mrf.mxu2 }
 0x507   : > { %v1732_v16 = vadd.f32 %v1731_v55, %v1712_v10 }
 0x509   : > { %v1755_v48 = vmul.f32 %v1752_v2, %v1732_v16 }
 0x50b   : > { %2213 = vst [vmem:[%s2626_s9 + $0x28] sm:$0xff] %v1755_v48  ;;  %v1768_v46 = vadd.f32 %v1755_v48, %v3121_v60 }
 0x50c   : > { %v1824_v60 = vld [vmem:[%s2624_s15] sm:$0xff] (%p2598_p5) }
 0x50d   : > { %1772 = vst [vmem:[%s2624_s15 + $0x8] sm:$0xff] %v1768_v46 }
 0x50e   : > { %v1734_v38 = vpop.f32.mrf.mxu2  ;;  %1825 = vst [vmem:[%s1789_s13] sm:$0xff] (%p2598_p5), %v1824_v60 }
 0x50f   : > { %v1735_v1 = vadd.f32 %v1734_v38, %v1715_v4 }
 0x511   : > { %v1756_v11 = vmul.f32 %v1752_v2, %v1735_v1 }
 0x513   : > { %2214 = vst [vmem:[%s2626_s9 + $0x30] sm:$0xff] %v1756_v11  ;;  %v1769_v19 = vadd.f32 %v1756_v11, %v3129_v47 }
 0x514   : > { %v1826_v47 = vld [vmem:[%s2624_s15 + $0x8] sm:$0xff] (%p2598_p5) }
 0x515   : > { %1773 = vst [vmem:[%s2624_s15 + $0x10] sm:$0xff] %v1769_v19 }
 0x516   : > { %v1736_v45 = vpop.f32.mrf.mxu2  ;;  %1827 = vst [vmem:[%s1789_s13 + $0x10] sm:$0xff] (%p2598_p5), %v1826_v47 }
 0x517   : > { %v1737_v35 = vadd.f32 %v1736_v45, %v1717_v37 }
 0x519   : > { %v1757_v36 = vmul.f32 %v1752_v2, %v1737_v35  ;;  %1785 = sbr.rel (!%p2598_p5) target bundleno = 1318 (0x526), region = 52 }
 0x51b   : > { %2215 = vst [vmem:[%s2626_s9 + $0x38] sm:$0xff] %v1757_v36  ;;  %v1770_v56 = vadd.f32 %v1757_v36, %v3137_v13 }
 0x51c   : > { %v1828_v13 = vld [vmem:[%s2624_s15 + $0x10] sm:$0xff] (%p2598_p5) }
 0x51d   : > { %1774 = vst [vmem:[%s2624_s15 + $0x18] sm:$0xff] %v1770_v56 }
 0x51e   : > { %1829 = vst [vmem:[%s1789_s13 + $0x20] sm:$0xff] %v1828_v13 }
 0x524   : > { %v1830_v53 = vld [vmem:[%s2624_s15 + $0x18] sm:$0xff] }
 0x525   : > { %1831 = vst [vmem:[%s1789_s13 + $0x30] sm:$0xff] %v1830_v53 }
 0x526 PF: > { %1837 = sbr.rel (!%p2598_p5) target bundleno = 1330 (0x532), region = 90  ;;  %s2220_s14 = sshll.u32 (%p2598_p5), %s2497_s27, 4  ;;  %v1884_v12 = vld [vmem:[%s2626_s9] sm:$0xff] (%p2598_p5)  ;;  %v1886_v7 = vld [vmem:[%s2626_s9 + $0x8] sm:$0xff] (%p2598_p5)  ;;  %v1888_v50 = vld [vmem:[%s2626_s9 + $0x10] sm:$0xff] (%p2598_p5) }
 0x527   : > { %s1839_s24 = sadd.s32 (%p2598_p5), %s2493_s26, %s2220_s14  ;;  %v1890_v43 = vld [vmem:[%s2626_s9 + $0x18] sm:$0xff] (%p2598_p5)  ;;  %v1892_v34 = vld [vmem:[%s2626_s9 + $0x20] sm:$0xff] (%p2598_p5)  ;;  %v1894_v33 = vld [vmem:[%s2626_s9 + $0x28] sm:$0xff] (%p2598_p5) }
 0x528   : > { %s2221_s15 = sshll.u32 (%p2598_p5), %s1839_s24, 3  ;;  %v1896_v44 = vld [vmem:[%s2626_s9 + $0x30] sm:$0xff] (%p2598_p5) }
 0x529   : > { %s1841_s12 = scalar_lea.vmem (%p2598_p5), %s3356_s7, %s2221_s15 }
 0x52a   : > { %1885 = vst [vmem:[%s1841_s12] sm:$0xff] (%p2598_p5), %v1884_v12  ;;  %v1898_v22 = vld [vmem:[%s2626_s9 + $0x38] sm:$0xff] (%p2598_p5) }
 0x52b   : > { %1887 = vst [vmem:[%s1841_s12 + $0x10] sm:$0xff] %v1886_v7 }
 0x52c   : > { %1889 = vst [vmem:[%s1841_s12 + $0x20] sm:$0xff] %v1888_v50 }
 0x52d   : > { %1891 = vst [vmem:[%s1841_s12 + $0x30] sm:$0xff] %v1890_v43 }
 0x52e   : > { %1893 = vst [vmem:[%s1841_s12 + $0x40] sm:$0xff] %v1892_v34 }
 0x52f   : > { %1895 = vst [vmem:[%s1841_s12 + $0x50] sm:$0xff] %v1894_v33 }
 0x530   : > { %1897 = vst [vmem:[%s1841_s12 + $0x60] sm:$0xff] %v1896_v44 }
 0x531   : > { %1899 = vst [vmem:[%s1841_s12 + $0x70] sm:$0xff] %v1898_v22 }
 0x532 PF: > { %s18_s30 = sadd.s32 1, %s2509_s30   ;;  %s3360_s19 = sld [smem:[#allocation6_spill]] }
 0x533   : > { %p15_p11 = scmp.ge.s32.totalorder %s18_s30, 6   ;;  %s3361_s24 = smov %s2489_s25 }
 0x534   : > { %s3362_s25 = smov %s2609_s16  ;;  %s3363_s26 = smov %s2501_s28 }
 0x535   : > { %s3364_s27 = smov %s2505_s29  ;;  %s3365_s28 = smov %s3368_s8 }
 0x536   :  { %17 = sbr.rel (!%p15_p11) target bundleno = 4 (0x4), region = 172 }
 0x538   : > { %s3366_s29 = smov %s3360_s19 }

</bundles_post_ra>
